<compile_context>
chip_gen: v7x
topology: tpu7x:2x2x1
jax: 0.10.0
libtpu: 0.0.40
codegen_flags: <defaults>
</compile_context>

<pallas_src>
import functools
import math

import jax
import jax.numpy as jnp
from jax.experimental import pallas as pl
from jax.experimental.pallas import tpu as pltpu


# ---------------------------------------------------------------------------
# Helpers
# ---------------------------------------------------------------------------
def _round_up(v, m):
    return ((v + m - 1) // m) * m


def _leaky_relu(x, slope=0.01):
    return jnp.where(x > 0, x, slope * x)


def _pad2(a, rows, cols):
    return jnp.pad(a, ((0, rows - a.shape[0]), (0, cols - a.shape[1])))


# ---------------------------------------------------------------------------
# Fused Pallas kernel: all cells + classifier + log_softmax
# ---------------------------------------------------------------------------
def make_fused_kernel(num_layers, h_pad):
    H = h_pad

    def kernel(*refs):
        # refs layout:
        #   [0] x            (n_pad, f_pad)        bf16   VMEM
        #   [1] m_stack      (2, n_pad, n_pad)     bf16   HBM (pl.ANY)
        #   per layer l (3 refs):
        #        wp          (in_pad, h_pad)       bf16
        #        w_slab      (h_pad, 5*h_pad)      bf16   [Wc0|Ws_root|Wc1|Ws_rel|Wl]
        #        b_slab      (4, h_pad)            f32    rows: bp, bc, bs_rel, bl
        #   [-2-k..] w_cls (h_pad, c_pad) bf16 ; b_cls (1, c_pad) f32 (pad lanes -1e30)
        #   then: out (n_pad, c_pad) f32 ; scratch: m_buf (2,n_pad,n_pad) bf16, dma sem
        x_ref, m_hbm = refs[0], refs[1]
        base = 2 + 3 * num_layers
        wcls_ref, bcls_ref = refs[base], refs[base + 1]
        out_ref = refs[base + 2]
        m_buf, m_sem = refs[base + 3], refs[base + 4]

        # Kick off the big operator DMA; layer-0's dense matmuls do not need it.
        m_copy = pltpu.make_async_copy(m_hbm, m_buf, m_sem)
        m_copy.start()

        x = x_ref[...]                       # bf16 activations, VMEM resident
        for l in range(num_layers):
            wp_ref, w_ref, b_ref = refs[2 + 3 * l: 5 + 3 * l]

            # preprocessor_x : Linear(cur_dim, hidden_dim)
            x1 = (jnp.dot(x, wp_ref[...], preferred_element_type=jnp.float32)
                  + b_ref[0:1, :])
            x1b = x1.astype(jnp.bfloat16)

            # one 512-lane matmul: x1 @ [Wc0 | Ws_root | Wc1 | Ws_rel]
            y = jnp.dot(x1b, w_ref[:, 0:4 * H],
                        preferred_element_type=jnp.float32)

            # propagation: (M @ x1) @ W == M @ (x1 @ W)
            if l == 0:
                m_copy.wait()                # hide DMA behind the matmuls above
            t_cheb = y[:, 2 * H:3 * H].astype(jnp.bfloat16)
            t_sage = y[:, 3 * H:4 * H].astype(jnp.bfloat16)

            # ChebConv(K=2): x1@W0 + M_cheb@(x1@W1) + bc
            cheb = (y[:, 0:H]
                    + jnp.dot(m_buf[0], t_cheb,
                              preferred_element_type=jnp.float32)
                    + b_ref[1:2, :])
            # SAGEConv: lin_root(x1) + lin_rel(mean_agg) (bias on rel part)
            sage = (y[:, H:2 * H]
                    + jnp.dot(m_buf[1], t_sage,
                              preferred_element_type=jnp.float32)
                    + b_ref[2:3, :])

            o12 = _leaky_relu(cheb) + _leaky_relu(sage)

            # cell.linear
            x = (jnp.dot(o12.astype(jnp.bfloat16), w_ref[:, 4 * H:5 * H],
                         preferred_element_type=jnp.float32)
                 + b_ref[3:4, :]).astype(jnp.bfloat16)

        # classifier + log_softmax (f32 reduction).  Padded class lanes carry a
        # -1e30 bias so they contribute exp(.) == 0 to the normalizer.
        logits = (jnp.dot(x, wcls_ref[...], preferred_element_type=jnp.float32)
                  + bcls_ref[...])
        mx = jnp.max(logits, axis=-1, keepdims=True)
        lse = mx + jnp.log(jnp.sum(jnp.exp(logits - mx), axis=-1, keepdims=True))
        out_ref[...] = logits - lse

    return kernel


# ---------------------------------------------------------------------------
# Plain-JAX glue: densify the graph into a stacked (2, n_pad, n_pad) operator
#   m[0] = -(D^{-1/2} A D^{-1/2})   (ChebConv K=2, sym norm, lambda_max=2)
#   m[1] = row-normalized weighted adjacency (SAGE mean aggregation)
# scattered directly into the padded buffer (no concat / pad / full divide).
# ---------------------------------------------------------------------------
def build_stacked_operator(edge_index, edge_weight, num_nodes, n_pad):
    row = edge_index[0]   # source
    col = edge_index[1]   # target
    w = edge_weight.astype(jnp.float32)

    # --- ChebConv scaled Laplacian off-diagonal values ---
    not_self = (row != col).astype(jnp.float32)
    w_ns = w * not_self                                   # remove_self_loops
    deg = jnp.zeros((num_nodes,), jnp.float32).at[row].add(w_ns)
    dis = jnp.where(deg > 0, 1.0 / jnp.sqrt(deg), 0.0)
    cheb_vals = -dis[row] * w_ns * dis[col]               # off-diag of (L - I)

    # --- SAGE weighted mean aggregation (normalization folded into values) ---
    cnt = jnp.zeros((num_nodes,), jnp.float32).at[col].add(jnp.ones_like(w))
    inv_cnt = jnp.where(cnt > 0, 1.0 / cnt, 0.0)
    sage_vals = w * inv_cnt[col]

    m = jnp.zeros((2, n_pad, n_pad), jnp.float32)
    m = m.at[0, col, row].add(cheb_vals)
    m = m.at[1, col, row].add(sage_vals)
    return m.astype(jnp.bfloat16)


# ---------------------------------------------------------------------------
# Deterministic parameter init (PyTorch-Linear-style uniform)
# ---------------------------------------------------------------------------
def _linear_init(key, fan_in, fan_out, bias=True):
    kw, kb = jax.random.split(key)
    bound = 1.0 / math.sqrt(fan_in)
    w = jax.random.uniform(kw, (fan_in, fan_out), jnp.float32, -bound, bound)
    if not bias:
        return w
    b = jax.random.uniform(kb, (1, fan_out), jnp.float32, -bound, bound)
    return w, b


def init_params(key, features_num, num_class, num_layers, hidden):
    hidden_dim = max(hidden, num_class * 2)
    output_dim = hidden_dim
    cells = []
    cur_dim = features_num
    keys = jax.random.split(key, num_layers + 1)
    for layer in range(num_layers):
        ks = jax.random.split(keys[layer], 8)
        wp, bp = _linear_init(ks[0], cur_dim, hidden_dim)
        wc0 = _linear_init(ks[1], hidden_dim, output_dim, bias=False)
        wc1 = _linear_init(ks[2], hidden_dim, output_dim, bias=False)
        bc = jax.random.uniform(ks[3], (1, output_dim), jnp.float32,
                                -1.0 / math.sqrt(hidden_dim),
                                1.0 / math.sqrt(hidden_dim))
        ws_rel, bs_rel = _linear_init(ks[4], hidden_dim, output_dim)
        ws_root = _linear_init(ks[5], hidden_dim, output_dim, bias=False)
        wl, bl = _linear_init(ks[6], output_dim, output_dim)
        cells.append(dict(wp=wp, bp=bp, wc0=wc0, wc1=wc1, bc=bc,
                          ws_rel=ws_rel, bs_rel=bs_rel, ws_root=ws_root,
                          wl=wl, bl=bl))
        cur_dim = output_dim
    w_cls, b_cls = _linear_init(keys[-1], cur_dim, num_class)
    return dict(cells=cells, w_cls=w_cls, b_cls=b_cls)


# ---------------------------------------------------------------------------
# Full model forward
# ---------------------------------------------------------------------------
@functools.partial(jax.jit, static_argnames=("num_nodes",))
def nas_autograph_c_forward(x, edge_index, edge_weight, params, *, num_nodes):
    n = num_nodes
    f_in = x.shape[1]
    h = params["cells"][0]["wp"].shape[1]      # hidden_dim == output_dim
    c = params["w_cls"].shape[1]
    num_layers = len(params["cells"])

    # pad every axis that lands in the lane dimension to a multiple of 128
    n_pad = _round_up(n, 128)
    f_pad = _round_up(f_in, 128)
    h_pad = _round_up(h, 128)
    c_pad = _round_up(c, 128)

    # dropout: eval mode => identity
    m_stack = build_stacked_operator(edge_index, edge_weight, n, n_pad)

    x_p = _pad2(x.astype(jnp.float32), n_pad, f_pad).astype(jnp.bfloat16)

    args = [x_p, m_stack]
    for l, p in enumerate(params["cells"]):
        in_pad = f_pad if l == 0 else h_pad
        wp = _pad2(p["wp"], in_pad, h_pad).astype(jnp.bfloat16)
        w_slab = jnp.concatenate(
            [_pad2(p["wc0"], h_pad, h_pad),
             _pad2(p["ws_root"], h_pad, h_pad),
             _pad2(p["wc1"], h_pad, h_pad),
             _pad2(p["ws_rel"], h_pad, h_pad),
             _pad2(p["wl"], h_pad, h_pad)], axis=1).astype(jnp.bfloat16)
        b_slab = jnp.concatenate(
            [_pad2(p["bp"], 1, h_pad),
             _pad2(p["bc"], 1, h_pad),
             _pad2(p["bs_rel"], 1, h_pad),
             _pad2(p["bl"], 1, h_pad)], axis=0)           # (4, h_pad) f32
        args += [wp, w_slab, b_slab]

    w_cls = _pad2(params["w_cls"], h_pad, c_pad).astype(jnp.bfloat16)
    b_cls = jnp.full((1, c_pad), -1e30, jnp.float32).at[:, :c].set(params["b_cls"])
    args += [w_cls, b_cls]

    out_shape = (n_pad, c_pad)
    kernel = make_fused_kernel(num_layers, h_pad)

    vmem_spec = pl.BlockSpec(memory_space=pltpu.MemorySpace.VMEM)
    any_spec = pl.BlockSpec(memory_space=pl.ANY)
    in_specs = [vmem_spec, any_spec] + [vmem_spec] * (3 * num_layers + 2)

    # Per-generation VMEM budget: single-buffered residency (no grid pipeline)
    # + intermediate estimate, capped at ~85% of this chip's VMEM.
    arg_bytes = sum(int(a.size) * a.dtype.itemsize for a in args)
    out_bytes = out_shape[0] * out_shape[1] * 4
    interm_bytes = n_pad * (6 * h_pad + 2 * c_pad) * 4
    need = arg_bytes + out_bytes + interm_bytes + (4 << 20)
    try:
        cap = int(pltpu.get_tpu_info().vmem_capacity_bytes)
    except Exception:
        cap = 64 << 20
    vmem_limit = int(max(16 << 20, min(need, int(cap * 0.85))))

    # advisory cost estimate for the XLA scheduler
    flops = 0
    in_dims = [f_pad] + [h_pad] * num_layers
    for l in range(num_layers):
        flops += 2 * n_pad * in_dims[l] * h_pad          # x @ wp
        flops += 2 * n_pad * h_pad * 4 * h_pad           # x1 @ [4H slab]
        flops += 2 * 2 * n_pad * n_pad * h_pad           # M_cheb / M_sage props
        flops += 2 * n_pad * h_pad * h_pad               # o12 @ wl
    flops += 2 * n_pad * h_pad * c_pad                   # classifier
    cost = pl.CostEstimate(flops=flops,
                           transcendentals=n_pad * c_pad,
                           bytes_accessed=arg_bytes + out_bytes)

    out = pl.pallas_call(
        kernel,
        out_shape=jax.ShapeDtypeStruct(out_shape, jnp.float32),
        in_specs=in_specs,
        out_specs=vmem_spec,
        scratch_shapes=[
            pltpu.VMEM((2, n_pad, n_pad), jnp.bfloat16),   # operator landing buffer
            pltpu.SemaphoreType.DMA(()),
        ],
        compiler_params=pltpu.CompilerParams(vmem_limit_bytes=vmem_limit),
        cost_estimate=cost,
    )(*args)

    return out[:n, :c]


# ---------------------------------------------------------------------------
if __name__ == "__main__":
    N, E = 128, 512
    features_num, num_class, hidden, num_layers = 16, 8, 32, 2

    key = jax.random.PRNGKey(0)
    kx, ke, kw, kp = jax.random.split(key, 4)
    x = jax.random.normal(kx, (N, features_num), jnp.float32)
    edge_index = jax.random.randint(ke, (2, E), 0, N, dtype=jnp.int32)
    edge_weight = jax.random.uniform(kw, (E,), jnp.float32, 0.1, 1.0)

    params = init_params(kp, features_num, num_class, num_layers, hidden)

    out = nas_autograph_c_forward(x, edge_index, edge_weight, params, num_nodes=N)
    out = jax.block_until_ready(out)

    assert out.shape == (N, num_class)
    assert bool(jnp.all(jnp.isfinite(out)))
    # rows of log_softmax must (approximately) exp-sum to 1
    assert bool(jnp.allclose(jnp.sum(jnp.exp(out), axis=-1), 1.0, atol=1e-4))
    print("KERNEL_OK")
</pallas_src>

<mosaic_0001>
module attributes {stable_mosaic.version = 11 : i64} {
  func.func private @main(%arg0: i32) attributes {dimension_semantics = [#tpu.dimension_semantics<core_parallel>], iteration_bounds = array<i64: 2>, tpu.core_type = #tpu.core_type<sc_scalar_subcore>, window_params = []} {
    return
  }
}

module attributes {stable_mosaic.version = 11 : i64} {
  func.func private @main(%arg0: i32) attributes {dimension_semantics = [#tpu.dimension_semantics<core_parallel>], iteration_bounds = array<i64: 2>, tpu.core_type = #tpu.core_type<sc_scalar_subcore>, window_params = []} {
    return
  }
}

module attributes {stable_mosaic.version = 11 : i64} {
  func.func @kernel(%arg0: memref<128x128xbf16, #tpu.memory_space<vmem>>, %arg1: memref<2x128x128xbf16, #tpu.memory_space<any>>, %arg2: memref<128x128xbf16, #tpu.memory_space<vmem>>, %arg3: memref<128x640xbf16, #tpu.memory_space<vmem>>, %arg4: memref<4x128xf32, #tpu.memory_space<vmem>>, %arg5: memref<128x128xbf16, #tpu.memory_space<vmem>>, %arg6: memref<128x640xbf16, #tpu.memory_space<vmem>>, %arg7: memref<4x128xf32, #tpu.memory_space<vmem>>, %arg8: memref<128x128xbf16, #tpu.memory_space<vmem>>, %arg9: memref<1x128xf32, #tpu.memory_space<vmem>>, %arg10: memref<128x128xf32, #tpu.memory_space<vmem>>, %arg11: memref<2x128x128xbf16, #tpu.memory_space<vmem>>, %arg12: memref<!tpu.dma_semaphore, #tpu.memory_space<semaphore_mem>>) attributes {dimension_semantics = [], scalar_prefetch = 0 : i64, scratch_operands = 2 : i64, tpu.core_type = #tpu.core_type<tc>} {
    tpu.enqueue_dma source(%arg1 : memref<2x128x128xbf16, #tpu.memory_space<any>>) target(%arg11 : memref<2x128x128xbf16, #tpu.memory_space<vmem>>) target_semaphore(%arg12 : memref<!tpu.dma_semaphore, #tpu.memory_space<semaphore_mem>>)
    %c0 = arith.constant 0 : index
    %c0_0 = arith.constant 0 : index
    %0 = vector.load %arg0[%c0, %c0_0] : memref<128x128xbf16, #tpu.memory_space<vmem>>, vector<128x128xbf16>
    %c0_1 = arith.constant 0 : index
    %c0_2 = arith.constant 0 : index
    %1 = vector.load %arg2[%c0_1, %c0_2] : memref<128x128xbf16, #tpu.memory_space<vmem>>, vector<128x128xbf16>
    %cst = arith.constant dense<0.000000e+00> : vector<128x128xf32>
    %2 = tpu.matmul %0, %1, %cst {dimension_numbers = #tpu.dot_dimension_numbers<[1], [0], [0], [1], [0, 0, 1, 1], [], []>} : vector<128x128xbf16>, vector<128x128xbf16>, vector<128x128xf32> -> vector<128x128xf32>
    %c0_3 = arith.constant 0 : index
    %c0_4 = arith.constant 0 : index
    %3 = vector.load %arg4[%c0_3, %c0_4] : memref<4x128xf32, #tpu.memory_space<vmem>>, vector<1x128xf32>
    %4 = vector.broadcast %3 : vector<1x128xf32> to vector<128x128xf32>
    %5 = arith.addf %2, %4 : vector<128x128xf32>
    %6 = arith.truncf %5 : vector<128x128xf32> to vector<128x128xbf16>
    %c0_5 = arith.constant 0 : index
    %c0_6 = arith.constant 0 : index
    %7 = vector.load %arg3[%c0_5, %c0_6] : memref<128x640xbf16, #tpu.memory_space<vmem>>, vector<128x512xbf16>
    %cst_7 = arith.constant dense<0.000000e+00> : vector<128x512xf32>
    %8 = tpu.matmul %6, %7, %cst_7 {dimension_numbers = #tpu.dot_dimension_numbers<[1], [0], [0], [1], [0, 0, 1, 1], [], []>} : vector<128x128xbf16>, vector<128x512xbf16>, vector<128x512xf32> -> vector<128x512xf32>
    tpu.wait_dma2 semaphore(%arg12 : memref<!tpu.dma_semaphore, #tpu.memory_space<semaphore_mem>>) src(%arg1 : memref<2x128x128xbf16, #tpu.memory_space<any>>) dst(%arg11 : memref<2x128x128xbf16, #tpu.memory_space<vmem>>)
    %9 = vector.extract_strided_slice %8 {offsets = [0, 256], sizes = [128, 128], strides = [1, 1]} : vector<128x512xf32> to vector<128x128xf32>
    %10 = arith.truncf %9 : vector<128x128xf32> to vector<128x128xbf16>
    %11 = vector.extract_strided_slice %8 {offsets = [0, 384], sizes = [128, 128], strides = [1, 1]} : vector<128x512xf32> to vector<128x128xf32>
    %12 = arith.truncf %11 : vector<128x128xf32> to vector<128x128xbf16>
    %13 = vector.extract_strided_slice %8 {offsets = [0, 0], sizes = [128, 128], strides = [1, 1]} : vector<128x512xf32> to vector<128x128xf32>
    %c0_8 = arith.constant 0 : index
    %c0_9 = arith.constant 0 : index
    %c0_10 = arith.constant 0 : index
    %14 = vector.load %arg11[%c0_8, %c0_9, %c0_10] : memref<2x128x128xbf16, #tpu.memory_space<vmem>>, vector<1x128x128xbf16>
    %15 = vector.shape_cast %14 : vector<1x128x128xbf16> to vector<128x128xbf16>
    %cst_11 = arith.constant dense<0.000000e+00> : vector<128x128xf32>
    %16 = tpu.matmul %15, %10, %cst_11 {dimension_numbers = #tpu.dot_dimension_numbers<[1], [0], [0], [1], [0, 0, 1, 1], [], []>} : vector<128x128xbf16>, vector<128x128xbf16>, vector<128x128xf32> -> vector<128x128xf32>
    %17 = arith.addf %13, %16 : vector<128x128xf32>
    %c1 = arith.constant 1 : index
    %c0_12 = arith.constant 0 : index
    %18 = vector.load %arg4[%c1, %c0_12] : memref<4x128xf32, #tpu.memory_space<vmem>>, vector<1x128xf32>
    %19 = vector.broadcast %18 : vector<1x128xf32> to vector<128x128xf32>
    %20 = arith.addf %17, %19 : vector<128x128xf32>
    %21 = vector.extract_strided_slice %8 {offsets = [0, 128], sizes = [128, 128], strides = [1, 1]} : vector<128x512xf32> to vector<128x128xf32>
    %c1_13 = arith.constant 1 : index
    %c0_14 = arith.constant 0 : index
    %c0_15 = arith.constant 0 : index
    %22 = vector.load %arg11[%c1_13, %c0_14, %c0_15] : memref<2x128x128xbf16, #tpu.memory_space<vmem>>, vector<1x128x128xbf16>
    %23 = vector.shape_cast %22 : vector<1x128x128xbf16> to vector<128x128xbf16>
    %cst_16 = arith.constant dense<0.000000e+00> : vector<128x128xf32>
    %24 = tpu.matmul %23, %12, %cst_16 {dimension_numbers = #tpu.dot_dimension_numbers<[1], [0], [0], [1], [0, 0, 1, 1], [], []>} : vector<128x128xbf16>, vector<128x128xbf16>, vector<128x128xf32> -> vector<128x128xf32>
    %25 = arith.addf %21, %24 : vector<128x128xf32>
    %c2 = arith.constant 2 : index
    %c0_17 = arith.constant 0 : index
    %26 = vector.load %arg4[%c2, %c0_17] : memref<4x128xf32, #tpu.memory_space<vmem>>, vector<1x128xf32>
    %27 = vector.broadcast %26 : vector<1x128xf32> to vector<128x128xf32>
    %28 = arith.addf %25, %27 : vector<128x128xf32>
    %cst_18 = arith.constant 0.000000e+00 : f32
    %29 = vector.broadcast %cst_18 : f32 to vector<128x128xf32>
    %30 = arith.cmpf ogt, %20, %29 : vector<128x128xf32>
    %cst_19 = arith.constant 0.00999999977 : f32
    %31 = vector.broadcast %cst_19 : f32 to vector<128x128xf32>
    %32 = arith.mulf %31, %20 : vector<128x128xf32>
    %33 = arith.select %30, %20, %32 : vector<128x128xi1>, vector<128x128xf32>
    %cst_20 = arith.constant 0.000000e+00 : f32
    %34 = vector.broadcast %cst_20 : f32 to vector<128x128xf32>
    %35 = arith.cmpf ogt, %28, %34 : vector<128x128xf32>
    %cst_21 = arith.constant 0.00999999977 : f32
    %36 = vector.broadcast %cst_21 : f32 to vector<128x128xf32>
    %37 = arith.mulf %36, %28 : vector<128x128xf32>
    %38 = arith.select %35, %28, %37 : vector<128x128xi1>, vector<128x128xf32>
    %39 = arith.addf %33, %38 : vector<128x128xf32>
    %40 = arith.truncf %39 : vector<128x128xf32> to vector<128x128xbf16>
    %c0_22 = arith.constant 0 : index
    %c512 = arith.constant 512 : index
    %41 = vector.load %arg3[%c0_22, %c512] : memref<128x640xbf16, #tpu.memory_space<vmem>>, vector<128x128xbf16>
    %cst_23 = arith.constant dense<0.000000e+00> : vector<128x128xf32>
    %42 = tpu.matmul %40, %41, %cst_23 {dimension_numbers = #tpu.dot_dimension_numbers<[1], [0], [0], [1], [0, 0, 1, 1], [], []>} : vector<128x128xbf16>, vector<128x128xbf16>, vector<128x128xf32> -> vector<128x128xf32>
    %c3 = arith.constant 3 : index
    %c0_24 = arith.constant 0 : index
    %43 = vector.load %arg4[%c3, %c0_24] : memref<4x128xf32, #tpu.memory_space<vmem>>, vector<1x128xf32>
    %44 = vector.broadcast %43 : vector<1x128xf32> to vector<128x128xf32>
    %45 = arith.addf %42, %44 : vector<128x128xf32>
    %46 = arith.truncf %45 : vector<128x128xf32> to vector<128x128xbf16>
    %c0_25 = arith.constant 0 : index
    %c0_26 = arith.constant 0 : index
    %47 = vector.load %arg5[%c0_25, %c0_26] : memref<128x128xbf16, #tpu.memory_space<vmem>>, vector<128x128xbf16>
    %cst_27 = arith.constant dense<0.000000e+00> : vector<128x128xf32>
    %48 = tpu.matmul %46, %47, %cst_27 {dimension_numbers = #tpu.dot_dimension_numbers<[1], [0], [0], [1], [0, 0, 1, 1], [], []>} : vector<128x128xbf16>, vector<128x128xbf16>, vector<128x128xf32> -> vector<128x128xf32>
    %c0_28 = arith.constant 0 : index
    %c0_29 = arith.constant 0 : index
    %49 = vector.load %arg7[%c0_28, %c0_29] : memref<4x128xf32, #tpu.memory_space<vmem>>, vector<1x128xf32>
    %50 = vector.broadcast %49 : vector<1x128xf32> to vector<128x128xf32>
    %51 = arith.addf %48, %50 : vector<128x128xf32>
    %52 = arith.truncf %51 : vector<128x128xf32> to vector<128x128xbf16>
    %c0_30 = arith.constant 0 : index
    %c0_31 = arith.constant 0 : index
    %53 = vector.load %arg6[%c0_30, %c0_31] : memref<128x640xbf16, #tpu.memory_space<vmem>>, vector<128x512xbf16>
    %cst_32 = arith.constant dense<0.000000e+00> : vector<128x512xf32>
    %54 = tpu.matmul %52, %53, %cst_32 {dimension_numbers = #tpu.dot_dimension_numbers<[1], [0], [0], [1], [0, 0, 1, 1], [], []>} : vector<128x128xbf16>, vector<128x512xbf16>, vector<128x512xf32> -> vector<128x512xf32>
    %55 = vector.extract_strided_slice %54 {offsets = [0, 256], sizes = [128, 128], strides = [1, 1]} : vector<128x512xf32> to vector<128x128xf32>
    %56 = arith.truncf %55 : vector<128x128xf32> to vector<128x128xbf16>
    %57 = vector.extract_strided_slice %54 {offsets = [0, 384], sizes = [128, 128], strides = [1, 1]} : vector<128x512xf32> to vector<128x128xf32>
    %58 = arith.truncf %57 : vector<128x128xf32> to vector<128x128xbf16>
    %59 = vector.extract_strided_slice %54 {offsets = [0, 0], sizes = [128, 128], strides = [1, 1]} : vector<128x512xf32> to vector<128x128xf32>
    %c0_33 = arith.constant 0 : index
    %c0_34 = arith.constant 0 : index
    %c0_35 = arith.constant 0 : index
    %60 = vector.load %arg11[%c0_33, %c0_34, %c0_35] : memref<2x128x128xbf16, #tpu.memory_space<vmem>>, vector<1x128x128xbf16>
    %61 = vector.shape_cast %60 : vector<1x128x128xbf16> to vector<128x128xbf16>
    %cst_36 = arith.constant dense<0.000000e+00> : vector<128x128xf32>
    %62 = tpu.matmul %61, %56, %cst_36 {dimension_numbers = #tpu.dot_dimension_numbers<[1], [0], [0], [1], [0, 0, 1, 1], [], []>} : vector<128x128xbf16>, vector<128x128xbf16>, vector<128x128xf32> -> vector<128x128xf32>
    %63 = arith.addf %59, %62 : vector<128x128xf32>
    %c1_37 = arith.constant 1 : index
    %c0_38 = arith.constant 0 : index
    %64 = vector.load %arg7[%c1_37, %c0_38] : memref<4x128xf32, #tpu.memory_space<vmem>>, vector<1x128xf32>
    %65 = vector.broadcast %64 : vector<1x128xf32> to vector<128x128xf32>
    %66 = arith.addf %63, %65 : vector<128x128xf32>
    %67 = vector.extract_strided_slice %54 {offsets = [0, 128], sizes = [128, 128], strides = [1, 1]} : vector<128x512xf32> to vector<128x128xf32>
    %c1_39 = arith.constant 1 : index
    %c0_40 = arith.constant 0 : index
    %c0_41 = arith.constant 0 : index
    %68 = vector.load %arg11[%c1_39, %c0_40, %c0_41] : memref<2x128x128xbf16, #tpu.memory_space<vmem>>, vector<1x128x128xbf16>
    %69 = vector.shape_cast %68 : vector<1x128x128xbf16> to vector<128x128xbf16>
    %cst_42 = arith.constant dense<0.000000e+00> : vector<128x128xf32>
    %70 = tpu.matmul %69, %58, %cst_42 {dimension_numbers = #tpu.dot_dimension_numbers<[1], [0], [0], [1], [0, 0, 1, 1], [], []>} : vector<128x128xbf16>, vector<128x128xbf16>, vector<128x128xf32> -> vector<128x128xf32>
    %71 = arith.addf %67, %70 : vector<128x128xf32>
    %c2_43 = arith.constant 2 : index
    %c0_44 = arith.constant 0 : index
    %72 = vector.load %arg7[%c2_43, %c0_44] : memref<4x128xf32, #tpu.memory_space<vmem>>, vector<1x128xf32>
    %73 = vector.broadcast %72 : vector<1x128xf32> to vector<128x128xf32>
    %74 = arith.addf %71, %73 : vector<128x128xf32>
    %cst_45 = arith.constant 0.000000e+00 : f32
    %75 = vector.broadcast %cst_45 : f32 to vector<128x128xf32>
    %76 = arith.cmpf ogt, %66, %75 : vector<128x128xf32>
    %cst_46 = arith.constant 0.00999999977 : f32
    %77 = vector.broadcast %cst_46 : f32 to vector<128x128xf32>
    %78 = arith.mulf %77, %66 : vector<128x128xf32>
    %79 = arith.select %76, %66, %78 : vector<128x128xi1>, vector<128x128xf32>
    %cst_47 = arith.constant 0.000000e+00 : f32
    %80 = vector.broadcast %cst_47 : f32 to vector<128x128xf32>
    %81 = arith.cmpf ogt, %74, %80 : vector<128x128xf32>
    %cst_48 = arith.constant 0.00999999977 : f32
    %82 = vector.broadcast %cst_48 : f32 to vector<128x128xf32>
    %83 = arith.mulf %82, %74 : vector<128x128xf32>
    %84 = arith.select %81, %74, %83 : vector<128x128xi1>, vector<128x128xf32>
    %85 = arith.addf %79, %84 : vector<128x128xf32>
    %86 = arith.truncf %85 : vector<128x128xf32> to vector<128x128xbf16>
    %c0_49 = arith.constant 0 : index
    %c512_50 = arith.constant 512 : index
    %87 = vector.load %arg6[%c0_49, %c512_50] : memref<128x640xbf16, #tpu.memory_space<vmem>>, vector<128x128xbf16>
    %cst_51 = arith.constant dense<0.000000e+00> : vector<128x128xf32>
    %88 = tpu.matmul %86, %87, %cst_51 {dimension_numbers = #tpu.dot_dimension_numbers<[1], [0], [0], [1], [0, 0, 1, 1], [], []>} : vector<128x128xbf16>, vector<128x128xbf16>, vector<128x128xf32> -> vector<128x128xf32>
    %c3_52 = arith.constant 3 : index
    %c0_53 = arith.constant 0 : index
    %89 = vector.load %arg7[%c3_52, %c0_53] : memref<4x128xf32, #tpu.memory_space<vmem>>, vector<1x128xf32>
    %90 = vector.broadcast %89 : vector<1x128xf32> to vector<128x128xf32>
    %91 = arith.addf %88, %90 : vector<128x128xf32>
    %92 = arith.truncf %91 : vector<128x128xf32> to vector<128x128xbf16>
    %c0_54 = arith.constant 0 : index
    %c0_55 = arith.constant 0 : index
    %93 = vector.load %arg8[%c0_54, %c0_55] : memref<128x128xbf16, #tpu.memory_space<vmem>>, vector<128x128xbf16>
    %cst_56 = arith.constant dense<0.000000e+00> : vector<128x128xf32>
    %94 = tpu.matmul %92, %93, %cst_56 {dimension_numbers = #tpu.dot_dimension_numbers<[1], [0], [0], [1], [0, 0, 1, 1], [], []>} : vector<128x128xbf16>, vector<128x128xbf16>, vector<128x128xf32> -> vector<128x128xf32>
    %c0_57 = arith.constant 0 : index
    %c0_58 = arith.constant 0 : index
    %95 = vector.load %arg9[%c0_57, %c0_58] : memref<1x128xf32, #tpu.memory_space<vmem>>, vector<1x128xf32>
    %96 = vector.broadcast %95 : vector<1x128xf32> to vector<128x128xf32>
    %97 = arith.addf %94, %96 : vector<128x128xf32>
    %cst_59 = arith.constant dense<0xFF800000> : vector<128xf32>
    %98 = vector.multi_reduction <maximumf>, %97, %cst_59 [1] : vector<128x128xf32> to vector<128xf32>
    %99 = vector.shape_cast %98 : vector<128xf32> to vector<128x1xf32>
    %100 = vector.broadcast %99 : vector<128x1xf32> to vector<128x128xf32>
    %101 = arith.subf %97, %100 : vector<128x128xf32>
    %102 = math.exp %101 : vector<128x128xf32>
    %cst_60 = arith.constant dense<0.000000e+00> : vector<128xf32>
    %103 = vector.multi_reduction <add>, %102, %cst_60 [1] : vector<128x128xf32> to vector<128xf32>
    %104 = vector.shape_cast %103 : vector<128xf32> to vector<128x1xf32>
    %105 = math.log %104 : vector<128x1xf32>
    %106 = arith.addf %99, %105 : vector<128x1xf32>
    %107 = vector.broadcast %106 : vector<128x1xf32> to vector<128x128xf32>
    %108 = arith.subf %97, %107 : vector<128x128xf32>
    %c0_61 = arith.constant 0 : index
    %c0_62 = arith.constant 0 : index
    %109 = vector.load %arg10[%c0_61, %c0_62] : memref<128x128xf32, #tpu.memory_space<vmem>>, vector<128x128xf32>
    tpu.vector_store %arg10[%c0_61, %c0_62], %108 {strides = array<i32>} : memref<128x128xf32, #tpu.memory_space<vmem>>, vector<128x128xf32>,
    return
  }
}

</mosaic_0001>

<bundles_post_ra>
// kernel: nas_autograph_c_forward.1
= control target key start
LH: loop header
LB: loop body
LE: loop exit
PB: predicated region body
PF: predicated region fallthrough
CT: control target
= control target key end

     0   :  { %s5007_s0 = inlined_call_operand.vmem [shape: bf16[128,128], index: 0, kind: input, shape index: {}]   ;;  %s5008_s1 = inlined_call_operand.vmem [shape: bf16[2,128,128], index: 1, kind: input, shape index: {}]   ;;  %s5009_s2 = inlined_call_operand.vmem [shape: bf16[128,128], index: 2, kind: input, shape index: {}]   ;;  %s5010_s3 = inlined_call_operand.vmem [shape: bf16[128,640], index: 3, kind: input, shape index: {}]   ;;  %s5011_s4 = inlined_call_operand.vmem [shape: f32[4,128], index: 4, kind: input, shape index: {}]   ;;  %s5012_s5 = inlined_call_operand.vmem [shape: bf16[128,128], index: 5, kind: input, shape index: {}]   ;;  %s5013_s6 = inlined_call_operand.vmem [shape: bf16[128,640], index: 6, kind: input, shape index: {}]   ;;  %s5014_s7 = inlined_call_operand.vmem [shape: f32[4,128], index: 7, kind: input, shape index: {}]   ;;  %s5015_s8 = inlined_call_operand.vmem [shape: bf16[128,128], index: 8, kind: input, shape index: {}]   ;;  %s5016_s9 = inlined_call_operand.vmem [shape: f32[1,128], index: 9, kind: input, shape index: {}]   ;;  %s5017_s10 = inlined_call_operand.vmem [shape: f32[128,128], index: 10, kind: output, shape index: {}]  }
   0x1   :  { %v3750_v0 = vld [vmem:[%s5008_s1] sm:$0xff]  ;;  %v3755_v1 = vld [vmem:[%s5008_s1 + $0x8] sm:$0xff]  ;;  %v3760_v2 = vld [vmem:[%s5008_s1 + $0x10] sm:$0xff] }
   0x2   :  { %v3765_v3 = vld [vmem:[%s5008_s1 + $0x18] sm:$0xff]  ;;  %v3770_v4 = vld [vmem:[%s5008_s1 + $0x20] sm:$0xff]  ;;  %v3775_v5 = vld [vmem:[%s5008_s1 + $0x28] sm:$0xff] }
   0x3   :  { %v3780_v6 = vld [vmem:[%s5008_s1 + $0x30] sm:$0xff]  ;;  %v3785_v7 = vld [vmem:[%s5008_s1 + $0x38] sm:$0xff]  ;;  %v3790_v8 = vld [vmem:[%s5008_s1 + $0x40] sm:$0xff] }
   0x4   :  { %5022 = vst [vmem:[#allocation6_spill] sm:$0xff] %v3785_v7  ;;  %v3795_v9 = vld [vmem:[%s5008_s1 + $0x48] sm:$0xff]  ;;  %v3800_v10 = vld [vmem:[%s5008_s1 + $0x50] sm:$0xff]  ;;  %v3805_v11 = vld [vmem:[%s5008_s1 + $0x58] sm:$0xff] }
   0x5   :  { %v3810_v12 = vld [vmem:[%s5008_s1 + $0x60] sm:$0xff]  ;;  %v3815_v13 = vld [vmem:[%s5008_s1 + $0x68] sm:$0xff]  ;;  %v3820_v14 = vld [vmem:[%s5008_s1 + $0x70] sm:$0xff] }
   0x6   :  { %v3825_v15 = vld [vmem:[%s5008_s1 + $0x78] sm:$0xff] }
   0x7   :  { %5023 = vst [vmem:[#allocation7_spill] sm:$0xff] %v3825_v15 }
   0x8   :  { %105 = vsyncadd [#allocation3], 2048  ;;  %v3481_v16 = vld [vmem:[%s5009_s2] sm:$0xff]   ;;  %v3482_v17 = vld [vmem:[%s5009_s2 + $0x8] sm:$0xff]  }
   0x9   :  { %3176 = vmatprep.subr.bf16.mxu0 %v3481_v16  ;;  %v3483_v18 = vld [vmem:[%s5009_s2 + $0x10] sm:$0xff]   ;;  %v3484_v19 = vld [vmem:[%s5009_s2 + $0x18] sm:$0xff]   ;;  %v3489_v20 = vld [vmem:[%s5007_s0] sm:$0xff]  }
   0xa   :  { %3177 = vmatpush3.bf16.msra.mxu0 %v3481_v16  ;;  %3192 = vmatprep.mubr.bf16.mxu0 %v3489_v20  ;;  %v3485_v21 = vld [vmem:[%s5009_s2 + $0x20] sm:$0xff]   ;;  %v3486_v22 = vld [vmem:[%s5009_s2 + $0x28] sm:$0xff]   ;;  %v3487_v25 = vld [vmem:[%s5009_s2 + $0x30] sm:$0xff]   ;;  %v5018_v16 = vmov 0  }
   0xb   :  { %3178 = vmatprep.subr.bf16.mxu0 %v3482_v17  ;;  %v3500_v23 = vld [vmem:[%s5010_s3 + $0x4] ss:$20 sps:$4 sm:$0xff]   ;;  %v3502_v24 = vld [vmem:[%s5010_s3] ss:$20 sps:$4 sm:$0xff]   ;;  %v3508_v27 = vld [vmem:[%s5010_s3 + $0x28] ss:$20 sps:$4 sm:$0xff]   ;;  %568 = vmatprep.mubr.bf16.mxu1 %v5018_v16 }
   0xc   :  { %536 = vmatprep.subr.bf16.mxu1 %v3500_v23  ;;  %v3506_v26 = vld [vmem:[%s5010_s3 + $0x2c] ss:$20 sps:$4 sm:$0xff]   ;;  %v3512_v28 = vld [vmem:[%s5010_s3 + $0x54] ss:$20 sps:$4 sm:$0xff]   ;;  %v3488_v29 = vld [vmem:[%s5009_s2 + $0x38] sm:$0xff]  }
   0xd   :  { %537 = vmatpush1.bf16.msra.mxu1 %v3502_v24  ;;  %v3514_v30 = vld [vmem:[%s5010_s3 + $0x50] ss:$20 sps:$4 sm:$0xff]   ;;  %v3490_v32 = vld [vmem:[%s5007_s0 + $0x8] sm:$0xff]   ;;  %v3526_v39 = vld [vmem:[%s5010_s3 + $0xa0] ss:$20 sps:$4 sm:$0xff]  }
   0xe   :  { %3179 = vmatpush3.bf16.msra.mxu0 %v3482_v17  ;;  %538 = vmatprep.subr.bf16.mxu1 %v3506_v26  ;;  %v3518_v31 = vld [vmem:[%s5010_s3 + $0x7c] ss:$20 sps:$4 sm:$0xff]   ;;  %v3499_v33 = vld [vmem:[%s5010_s3 + $0xc] ss:$20 sps:$4 sm:$0xff]   ;;  %v3524_v36 = vld [vmem:[%s5010_s3 + $0xa4] ss:$20 sps:$4 sm:$0xff]  }
   0xf   :  { %3180 = vmatprep.subr.bf16.mxu0 %v3483_v18  ;;  %v3520_v34 = vld [vmem:[%s5010_s3 + $0x78] ss:$20 sps:$4 sm:$0xff]   ;;  %v3491_v35 = vld [vmem:[%s5007_s0 + $0x10] sm:$0xff]   ;;  %v3497_v37 = vld [vmem:[%s5010_s3 + $0x8] ss:$20 sps:$4 sm:$0xff]  }
  0x10   :  { %v3505_v38 = vld [vmem:[%s5010_s3 + $0x34] ss:$20 sps:$4 sm:$0xff]   ;;  %v3530_v40 = vld [vmem:[%s5010_s3 + $0xcc] ss:$20 sps:$4 sm:$0xff]   ;;  %v3503_v41 = vld [vmem:[%s5010_s3 + $0x30] ss:$20 sps:$4 sm:$0xff]  }
  0x11   :  { %539 = vmatpush1.bf16.msra.mxu1 %v3508_v27  ;;  %v3511_v42 = vld [vmem:[%s5010_s3 + $0x5c] ss:$20 sps:$4 sm:$0xff]   ;;  %v3493_v45 = vld [vmem:[%s5007_s0 + $0x20] sm:$0xff]   ;;  %v3509_v46 = vld [vmem:[%s5010_s3 + $0x58] ss:$20 sps:$4 sm:$0xff]  }
  0x12   :  { %3181 = vmatpush3.bf16.msra.mxu0 %v3483_v18  ;;  %540 = vmatprep.subr.bf16.mxu1 %v3512_v28  ;;  %v3532_v43 = vld [vmem:[%s5010_s3 + $0xc8] ss:$20 sps:$4 sm:$0xff]   ;;  %v3517_v47 = vld [vmem:[%s5010_s3 + $0x84] ss:$20 sps:$4 sm:$0xff]   ;;  %v3515_v48 = vld [vmem:[%s5010_s3 + $0x80] ss:$20 sps:$4 sm:$0xff]  }
  0x13   :  { %3182 = vmatprep.subr.bf16.mxu0 %v3484_v19  ;;  %v3492_v44 = vld [vmem:[%s5007_s0 + $0x18] sm:$0xff]   ;;  %v3523_v49 = vld [vmem:[%s5010_s3 + $0xac] ss:$20 sps:$4 sm:$0xff]   ;;  %v3495_v51 = vld [vmem:[%s5007_s0 + $0x30] sm:$0xff]  }
  0x14   :  { %v3494_v50 = vld [vmem:[%s5007_s0 + $0x28] sm:$0xff]   ;;  %v3527_v54 = vld [vmem:[%s5010_s3 + $0xd0] ss:$20 sps:$4 sm:$0xff]   ;;  %v3496_v56 = vld [vmem:[%s5007_s0 + $0x38] sm:$0xff]  }
  0x15   :  { %541 = vmatpush1.bf16.msra.mxu1 %v3514_v30  ;;  %v3521_v52 = vld [vmem:[%s5010_s3 + $0xa8] ss:$20 sps:$4 sm:$0xff]   ;;  %v3533_v57 = vld [vmem:[%s5010_s3 + $0xf8] ss:$20 sps:$4 sm:$0xff]   ;;  %v3538_v59 = vld [vmem:[%s5010_s3 + $0xf0] ss:$20 sps:$4 sm:$0xff]  }
  0x16   :  { %3183 = vmatpush3.bf16.msra.mxu0 %v3484_v19  ;;  %542 = vmatprep.subr.bf16.mxu1 %v3518_v31  ;;  %v3529_v53 = vld [vmem:[%s5010_s3 + $0xd4] ss:$20 sps:$4 sm:$0xff]   ;;  %v3535_v55 = vld [vmem:[%s5010_s3 + $0xfc] ss:$20 sps:$4 sm:$0xff]   ;;  %v3541_v60 = vld [vmem:[%s5010_s3 + $0x124] ss:$20 sps:$4 sm:$0xff]  }
  0x17   :  { %3184 = vmatprep.subr.bf16.mxu0 %v3485_v21  ;;  %v3536_v58 = vld [vmem:[%s5010_s3 + $0xf4] ss:$20 sps:$4 sm:$0xff]   ;;  %v3542_v61 = vld [vmem:[%s5010_s3 + $0x11c] ss:$20 sps:$4 sm:$0xff]   ;;  %v3544_v63 = vld [vmem:[%s5010_s3 + $0x118] ss:$20 sps:$4 sm:$0xff]  }
  0x18   :  { %v3539_v62 = vld [vmem:[%s5010_s3 + $0x120] ss:$20 sps:$4 sm:$0xff]  }
  0x19   :  { %543 = vmatpush1.bf16.msra.mxu1 %v3520_v34  ;;  %v2910_v18 = vld [vmem:[%s5011_s4] ss:$0 sm:$0xff] }
  0x1a   :  { %3185 = vmatpush3.bf16.msra.mxu0 %v3485_v21  ;;  %544 = vmatprep.subr.bf16.mxu1 %v3524_v36 }
  0x1b   :  { %3186 = vmatprep.subr.bf16.mxu0 %v3486_v22 }
  0x1d   :  { %545 = vmatpush1.bf16.msra.mxu1 %v3526_v39 }
  0x1e   :  { %3187 = vmatpush3.bf16.msra.mxu0 %v3486_v22  ;;  %546 = vmatprep.subr.bf16.mxu1 %v3530_v40 }
  0x1f   :  { %3188 = vmatprep.subr.bf16.mxu0 %v3487_v25 }
  0x21   :  { %547 = vmatpush1.bf16.msra.mxu1 %v3532_v43 }
  0x22   :  { %3189 = vmatpush3.bf16.msra.mxu0 %v3487_v25  ;;  %548 = vmatprep.subr.bf16.mxu1 %v3536_v58 }
  0x23   :  { %3190 = vmatprep.subr.bf16.mxu0 %v3488_v29 }
  0x25   :  { %549 = vmatpush1.bf16.msra.mxu1 %v3538_v59 }
  0x26   :  { %3191 = vmatpush3.bf16.msra.mxu0 %v3488_v29  ;;  %550 = vmatprep.subr.bf16.mxu1 %v3542_v61 }
  0x27   :  { %649 = vmatprep.subr.bf16.mxu0 %v3499_v33 }
  0x29   :  { %3193 = vmatmul.mubr.bf16.vlgmr.msra.gmra.mrb[0].mxu0 %v3490_v32  ;;  %551 = vmatpush1.bf16.msra.mxu1 %v3544_v63 }
  0x2a   :  { %3196 = vmatprep.mubr.bf16.mxu0 %v3491_v35  ;;  %650 = vmatpush1.bf16.msra.mxu0 %v3497_v37 }
  0x2b   :  { %651 = vmatprep.subr.bf16.mxu0 %v3505_v38 }
  0x2e   :  { %652 = vmatpush1.bf16.msra.mxu0 %v3503_v41 }
  0x2f   :  { %653 = vmatprep.subr.bf16.mxu0 %v3511_v42 }
  0x31   :  { %3197 = vmatmul.mubr.bf16.gmra.mrb[4].mxu0 %v3492_v44 }
  0x32   :  { %3200 = vmatprep.mubr.bf16.mxu0 %v3493_v45  ;;  %654 = vmatpush1.bf16.msra.mxu0 %v3509_v46 }
  0x33   :  { %655 = vmatprep.subr.bf16.mxu0 %v3517_v47 }
  0x36   :  { %656 = vmatpush1.bf16.msra.mxu0 %v3515_v48 }
  0x37   :  { %657 = vmatprep.subr.bf16.mxu0 %v3523_v49 }
  0x39   :  { %3201 = vmatmul.mubr.bf16.gmra.mrb[8].mxu0 %v3494_v50 }
  0x3a   :  { %3204 = vmatprep.mubr.bf16.mxu0 %v3495_v51  ;;  %658 = vmatpush1.bf16.msra.mxu0 %v3521_v52 }
  0x3b   :  { %659 = vmatprep.subr.bf16.mxu0 %v3529_v53 }
  0x3e   :  { %660 = vmatpush1.bf16.msra.mxu0 %v3527_v54 }
  0x3f   :  { %661 = vmatprep.subr.bf16.mxu0 %v3535_v55 }
  0x41   :  { %3205 = vmatmul.mubr.bf16.gmra.mrb[12].mxu0 %v3496_v56 }
  0x42   :  { %662 = vmatpush1.bf16.msra.mxu0 %v3533_v57  ;;  %681 = vmatprep.mubr.bf16.mxu0 %v5018_v16 }
  0x43   :  { %663 = vmatprep.subr.bf16.mxu0 %v3541_v60 }
  0x46   :  { %664 = vmatpush1.bf16.msra.mxu0 %v3539_v62 }
  0xfc   :  { %v3194_v17 = vpop.f32.mrb[0].mxu0 }
  0xfd   :  { %v273_v19 = vpop.f32.mrb[1].mxu0  ;;  %v282_v21 = vadd.f32 %v3194_v17, %v2910_v18 }
  0xfe   :  { %v3195_v20 = vpop.f32.mrb[2].mxu0  ;;  %v274_v24 = vadd.f32 %v2910_v18, %v273_v19 }
  0xff   :  { %v285_v22 = vadd.f32 %v3195_v20, %v2910_v18  ;;  %v276_v23 = vpop.f32.mrb[3].mxu0 }
 0x100   :  { %v277_v25 = vadd.f32 %v2910_v18, %v276_v23 }
 0x101   :  { %v337_v26 = vpack.c.bf16 %v285_v22, %v282_v21 }
 0x102   :  { %v336_v27 = vpack.c.bf16 %v277_v25, %v274_v24 }
 0x104   :  { %569 = vmatmul.mubr.bf16.vlgmr.msra.gmra.mrb[0].mxu1 %v336_v27  ;;  %682 = vmatmul.mubr.bf16.vlgmr.msra.gmra.mrb[16].mxu0 %v336_v27  ;;  %v3198_v28 = vpop.f32.mrb[4].mxu0 }
 0x105   :  { %v298_v29 = vadd.f32 %v3198_v28, %v2910_v18  ;;  %v289_v30 = vpop.f32.mrb[5].mxu0  ;;  %578 = vmatprep.mubr.bf16.mxu1 %v5018_v16  ;;  %691 = vmatprep.mubr.bf16.mxu0 %v5018_v16 }
 0x106   :  { %v290_v31 = vadd.f32 %v2910_v18, %v289_v30  ;;  %v3199_v32 = vpop.f32.mrb[6].mxu0 }
 0x107   :  { %v301_v33 = vadd.f32 %v3199_v32, %v2910_v18  ;;  %v292_v34 = vpop.f32.mrb[7].mxu0 }
 0x108   :  { %v293_v35 = vadd.f32 %v2910_v18, %v292_v34 }
 0x109   :  { %v339_v36 = vpack.c.bf16 %v301_v33, %v298_v29 }
 0x10a   :  { %v338_v37 = vpack.c.bf16 %v293_v35, %v290_v31 }
 0x10c   :  { %579 = vmatmul.mubr.bf16.gmra.mrb[4].mxu1 %v337_v26  ;;  %692 = vmatmul.mubr.bf16.gmra.mrb[20].mxu0 %v337_v26  ;;  %v3202_v38 = vpop.f32.mrb[8].mxu0 }
 0x10d   :  { %588 = vmatprep.mubr.bf16.mxu1 %v5018_v16  ;;  %701 = vmatprep.mubr.bf16.mxu0 %v5018_v16  ;;  %v314_v39 = vadd.f32 %v3202_v38, %v2910_v18  ;;  %v305_v40 = vpop.f32.mrb[9].mxu0 }
 0x10e   :  { %v306_v41 = vadd.f32 %v2910_v18, %v305_v40  ;;  %v3203_v42 = vpop.f32.mrb[10].mxu0 }
 0x10f   :  { %v317_v43 = vadd.f32 %v3203_v42, %v2910_v18  ;;  %v308_v44 = vpop.f32.mrb[11].mxu0 }
 0x110   :  { %v309_v45 = vadd.f32 %v2910_v18, %v308_v44 }
 0x111   :  { %v341_v46 = vpack.c.bf16 %v317_v43, %v314_v39 }
 0x112   :  { %v340_v47 = vpack.c.bf16 %v309_v45, %v306_v41 }
 0x114   :  { %589 = vmatmul.mubr.bf16.gmra.mrb[8].mxu1 %v338_v37  ;;  %702 = vmatmul.mubr.bf16.gmra.mrb[24].mxu0 %v338_v37  ;;  %v3206_v48 = vpop.f32.mrb[12].mxu0 }
 0x115   :  { %598 = vmatprep.mubr.bf16.mxu1 %v5018_v16  ;;  %711 = vmatprep.mubr.bf16.mxu0 %v5018_v16  ;;  %v330_v49 = vadd.f32 %v3206_v48, %v2910_v18  ;;  %v321_v50 = vpop.f32.mrb[13].mxu0 }
 0x116   :  { %v322_v51 = vadd.f32 %v2910_v18, %v321_v50  ;;  %v3207_v52 = vpop.f32.mrb[14].mxu0 }
 0x117   :  { %v333_v53 = vadd.f32 %v3207_v52, %v2910_v18  ;;  %v324_v54 = vpop.f32.mrb[15].mxu0 }
 0x118   :  { %v325_v55 = vadd.f32 %v2910_v18, %v324_v54 }
 0x119   :  { %v343_v56 = vpack.c.bf16 %v333_v53, %v330_v49 }
 0x11a   :  { %v342_v57 = vpack.c.bf16 %v325_v55, %v322_v51 }
 0x11c   :  { %599 = vmatmul.mubr.bf16.gmra.mrb[12].mxu1 %v339_v36  ;;  %712 = vmatmul.mubr.bf16.gmra.mrb[28].mxu0 %v339_v36 }
 0x11d   :  { %608 = vmatprep.mubr.bf16.mxu1 %v5018_v16  ;;  %721 = vmatprep.mubr.bf16.mxu0 %v5018_v16 }
 0x124   :  { %609 = vmatmul.mubr.bf16.gmra.mrb[16].mxu1 %v340_v47  ;;  %722 = vmatmul.mubr.bf16.gmra.mrb[32].mxu0 %v340_v47 }
 0x125   :  { %618 = vmatprep.mubr.bf16.mxu1 %v5018_v16  ;;  %731 = vmatprep.mubr.bf16.mxu0 %v5018_v16 }
 0x12c   :  { %619 = vmatmul.mubr.bf16.gmra.mrb[20].mxu1 %v341_v46  ;;  %732 = vmatmul.mubr.bf16.gmra.mrb[36].mxu0 %v341_v46 }
 0x12d   :  { %628 = vmatprep.mubr.bf16.mxu1 %v5018_v16  ;;  %741 = vmatprep.mubr.bf16.mxu0 %v5018_v16 }
 0x134   :  { %629 = vmatmul.mubr.bf16.gmra.mrb[24].mxu1 %v342_v57  ;;  %742 = vmatmul.mubr.bf16.gmra.mrb[40].mxu0 %v342_v57 }
 0x135   :  { %638 = vmatprep.mubr.bf16.mxu1 %v5018_v16  ;;  %751 = vmatprep.mubr.bf16.mxu0 %v5018_v16 }
 0x13c   :  { %639 = vmatmul.mubr.bf16.gmra.mrb[28].mxu1 %v343_v56  ;;  %752 = vmatmul.mubr.bf16.gmra.mrb[44].mxu0 %v343_v56 }
 0x13d   :  { %3224 = vmatprep.mubr.bf16.mxu1 %v3750_v0 }
 0x1d7   :  { %v3990_v58 = vpop.f32.mrb[0].mxu1  ;;  %v3992_v59 = vpop.f32.mrb[16].mxu0 }
 0x1d8   :  { %v3994_v60 = vpop.f32.mrb[1].mxu1  ;;  %v685_v61 = vpop.f32.mrb[17].mxu0 }
 0x1d9   :  { %v3996_v62 = vpop.f32.mrb[2].mxu1  ;;  %v687_v63 = vpop.f32.mrb[18].mxu0 }
 0x1da   :  { %v3998_v17 = vpop.f32.mrb[3].mxu1  ;;  %v689_v18 = vpop.f32.mrb[19].mxu0 }
 0x1db   :  { %5024 = vst [vmem:[#allocation8_spill] sm:$0xff] %v3998_v17 }
 0x1df   :  { %v4000_v19 = vpop.f32.mrb[4].mxu1  ;;  %v693_v20 = vpop.f32.mrb[20].mxu0 }
 0x1e0   :  { %v4002_v21 = vpop.f32.mrb[5].mxu1  ;;  %v695_v22 = vpop.f32.mrb[21].mxu0 }
 0x1e1   :  { %v4004_v23 = vpop.f32.mrb[6].mxu1  ;;  %v697_v24 = vpop.f32.mrb[22].mxu0 }
 0x1e2   :  { %v4006_v25 = vpop.f32.mrb[7].mxu1  ;;  %v699_v26 = vpop.f32.mrb[23].mxu0 }
 0x1e3   :  { %v776_v17 = vpack.c.bf16 %v699_v26, %v695_v22 }
 0x1e7   :  { %v4008_v27 = vpop.f32.mrb[8].mxu1  ;;  %v703_v28 = vpop.f32.mrb[24].mxu0 }
 0x1e8   :  { %5025 = vst [vmem:[#allocation9_spill] sm:$0xff] %v4008_v27  ;;  %v4010_v29 = vpop.f32.mrb[9].mxu1  ;;  %v705_v30 = vpop.f32.mrb[25].mxu0 }
 0x1e9   :  { %5026 = vst [vmem:[#allocation10_spill] sm:$0xff] %v4010_v29  ;;  %v4012_v31 = vpop.f32.mrb[10].mxu1  ;;  %v707_v32 = vpop.f32.mrb[26].mxu0 }
 0x1ea   :  { %5027 = vst [vmem:[#allocation11_spill] sm:$0xff] %v4012_v31  ;;  %v4014_v33 = vpop.f32.mrb[11].mxu1  ;;  %v709_v34 = vpop.f32.mrb[27].mxu0 }
 0x1eb   :  { %5028 = vst [vmem:[#allocation12_spill] sm:$0xff] %v4014_v33 }
 0x1ef   :  { %v4016_v35 = vpop.f32.mrb[12].mxu1  ;;  %v713_v36 = vpop.f32.mrb[28].mxu0 }
 0x1f0   :  { %5029 = vst [vmem:[#allocation13_spill] sm:$0xff] %v4016_v35  ;;  %v4018_v37 = vpop.f32.mrb[13].mxu1  ;;  %v715_v38 = vpop.f32.mrb[29].mxu0  ;;  %v775_v35 = vpack.c.bf16 %v689_v18, %v685_v61 }
 0x1f1   :  { %5030 = vst [vmem:[#allocation14_spill] sm:$0xff] %v4018_v37  ;;  %v4020_v39 = vpop.f32.mrb[14].mxu1  ;;  %v717_v40 = vpop.f32.mrb[30].mxu0 }
 0x1f2   :  { %5031 = vst [vmem:[#allocation15_spill] sm:$0xff] %v4020_v39  ;;  %v4022_v41 = vpop.f32.mrb[15].mxu1  ;;  %v719_v42 = vpop.f32.mrb[31].mxu0 }
 0x1f3   :  { %5032 = vst [vmem:[#allocation16_spill] sm:$0xff] %v4022_v41 }
 0x1f7   :  { %v4024_v43 = vpop.f32.mrb[16].mxu1  ;;  %v723_v44 = vpop.f32.mrb[32].mxu0 }
 0x1f8   :  { %5033 = vst [vmem:[#allocation17_spill] sm:$0xff] %v4024_v43  ;;  %v4026_v45 = vpop.f32.mrb[17].mxu1  ;;  %v725_v46 = vpop.f32.mrb[33].mxu0 }
 0x1f9   :  { %5034 = vst [vmem:[#allocation18_spill] sm:$0xff] %v4026_v45  ;;  %v4028_v47 = vpop.f32.mrb[18].mxu1  ;;  %v727_v48 = vpop.f32.mrb[34].mxu0 }
 0x1fa   :  { %5035 = vst [vmem:[#allocation19_spill] sm:$0xff] %v4028_v47  ;;  %v4030_v49 = vpop.f32.mrb[19].mxu1  ;;  %v729_v50 = vpop.f32.mrb[35].mxu0 }
 0x1fb   :  { %5036 = vst [vmem:[#allocation20_spill] sm:$0xff] %v4030_v49 }
 0x1ff   :  { %v4032_v51 = vpop.f32.mrb[20].mxu1  ;;  %v733_v52 = vpop.f32.mrb[36].mxu0 }
 0x200   :  { %5037 = vst [vmem:[#allocation21_spill] sm:$0xff] %v4032_v51  ;;  %v4034_v53 = vpop.f32.mrb[21].mxu1  ;;  %v735_v54 = vpop.f32.mrb[37].mxu0 }
 0x201   :  { %5038 = vst [vmem:[#allocation22_spill] sm:$0xff] %v4034_v53  ;;  %v4036_v55 = vpop.f32.mrb[22].mxu1  ;;  %v737_v56 = vpop.f32.mrb[38].mxu0 }
 0x202   :  { %5039 = vst [vmem:[#allocation23_spill] sm:$0xff] %v4036_v55  ;;  %v4038_v57 = vpop.f32.mrb[23].mxu1  ;;  %v739_v16 = vpop.f32.mrb[39].mxu0 }
 0x203   :  { %5040 = vst [vmem:[#allocation24_spill] sm:$0xff] %v4038_v57 }
 0x207   :  { %v4040_v45 = vpop.f32.mrb[24].mxu1  ;;  %v743_v43 = vpop.f32.mrb[40].mxu0 }
 0x208   :  { %5041 = vst [vmem:[#allocation25_spill] sm:$0xff] %v4040_v45  ;;  %v4042_v47 = vpop.f32.mrb[25].mxu1  ;;  %v745_v33 = vpop.f32.mrb[41].mxu0 }
 0x209   :  { %5042 = vst [vmem:[#allocation26_spill] sm:$0xff] %v4042_v47  ;;  %v4044_v49 = vpop.f32.mrb[26].mxu1  ;;  %v747_v31 = vpop.f32.mrb[42].mxu0  ;;  %v767_v47 = vpack.c.bf16 %v687_v63, %v3992_v59 }
 0x20a   :  { %5043 = vst [vmem:[#allocation27_spill] sm:$0xff] %v4044_v49  ;;  %v4046_v51 = vpop.f32.mrb[27].mxu1  ;;  %v749_v41 = vpop.f32.mrb[43].mxu0  ;;  %v768_v49 = vpack.c.bf16 %v697_v24, %v693_v20 }
 0x20b   :  { %5044 = vst [vmem:[#allocation28_spill] sm:$0xff] %v4046_v51 }
 0x20f   :  { %v4048_v53 = vpop.f32.mrb[28].mxu1  ;;  %v753_v39 = vpop.f32.mrb[44].mxu0 }
 0x210   :  { %v4050_v55 = vpop.f32.mrb[29].mxu1  ;;  %v755_v29 = vpop.f32.mrb[45].mxu0 }
 0x211   :  { %v4052_v57 = vpop.f32.mrb[30].mxu1  ;;  %v757_v27 = vpop.f32.mrb[46].mxu0 }
 0x212   :  { %v4054_v45 = vpop.f32.mrb[31].mxu1  ;;  %v759_v37 = vpop.f32.mrb[47].mxu0 }
 0x213   :  { %5045 = vst [vmem:[#allocation29_spill] sm:$0xff] %v4054_v45 }
 0x214   :  { %3689 = dma.done.wait [#allocation3], 2048 }
 0x215   :  { %3690 = vsyncadd [#allocation3], 4294965248  ;;  %3256 = vmatprep.mubr.bf16.mxu0 %v3790_v8  ;;  %3208 = vmatprep.subr.bf16.mxu1 %v767_v47  ;;  %v769_v51 = vpack.c.bf16 %v707_v32, %v703_v28  ;;  %v777_v45 = vpack.c.bf16 %v709_v34, %v705_v30  ;;  %v770_v59 = vpack.c.bf16 %v717_v40, %v713_v36  ;;  %v3545_v30 = vld [vmem:[%s5010_s3 + $0x10] ss:$20 sps:$4 sm:$0xff]   ;;  %v3550_v32 = vld [vmem:[%s5010_s3 + $0xd8] ss:$20 sps:$4 sm:$0xff]  }
 0x216   :  { %3240 = vmatprep.subr.bf16.mxu0 %v775_v35  ;;  %3209 = vmatpush3.bf16.msra.mxu1 %v767_v47  ;;  %v778_v61 = vpack.c.bf16 %v719_v42, %v715_v38  ;;  %v771_v63 = vpack.c.bf16 %v727_v48, %v723_v44  ;;  %v779_v18 = vpack.c.bf16 %v729_v50, %v725_v46  ;;  %v3552_v34 = vld [vmem:[%s5010_s3 + $0x128] ss:$20 sps:$4 sm:$0xff]   ;;  %v4118_v42 = vld [vmem:[%s5011_s4 + $0x1] ss:$0 sm:$0xff]  ;;  %v4123_v44 = vld [vmem:[%s5011_s4 + $0x2] ss:$0 sm:$0xff] }
 0x217   :  { %3241 = vmatpush3.bf16.msra.mxu0 %v775_v35  ;;  %3210 = vmatprep.subr.bf16.mxu1 %v768_v49  ;;  %v772_v20 = vpack.c.bf16 %v737_v56, %v733_v52  ;;  %v780_v22 = vpack.c.bf16 %v739_v16, %v735_v54  ;;  %v781_v24 = vpack.c.bf16 %v749_v41, %v745_v33  ;;  %v3546_v16 = vld [vmem:[%s5010_s3 + $0x38] ss:$20 sps:$4 sm:$0xff]   ;;  %v3551_v33 = vld [vmem:[%s5010_s3 + $0x100] ss:$20 sps:$4 sm:$0xff]  }
 0x218   :  { %3242 = vmatprep.subr.bf16.mxu0 %v776_v17  ;;  %v774_v26 = vpack.c.bf16 %v757_v27, %v753_v39  ;;  %v782_v28 = vpack.c.bf16 %v759_v37, %v755_v29  ;;  %v3547_v27 = vld [vmem:[%s5010_s3 + $0x60] ss:$20 sps:$4 sm:$0xff]   ;;  %v3548_v29 = vld [vmem:[%s5010_s3 + $0x88] ss:$20 sps:$4 sm:$0xff]  }
 0x219   :  { %v3553_v35 = vld [vmem:[%s5012_s5] sm:$0xff]   ;;  %v3554_v36 = vld [vmem:[%s5012_s5 + $0x8] sm:$0xff]   ;;  %v3555_v37 = vld [vmem:[%s5012_s5 + $0x10] sm:$0xff]  }
 0x21a   :  { %3211 = vmatpush3.bf16.msra.mxu1 %v768_v49  ;;  %v3556_v38 = vld [vmem:[%s5012_s5 + $0x18] sm:$0xff]   ;;  %v3557_v39 = vld [vmem:[%s5012_s5 + $0x20] sm:$0xff]   ;;  %v3558_v40 = vld [vmem:[%s5012_s5 + $0x28] sm:$0xff]  }
 0x21b   :  { %3243 = vmatpush3.bf16.msra.mxu0 %v776_v17  ;;  %3212 = vmatprep.subr.bf16.mxu1 %v769_v51  ;;  %v773_v17 = vpack.c.bf16 %v747_v31, %v743_v43  ;;  %v3549_v31 = vld [vmem:[%s5010_s3 + $0xb0] ss:$20 sps:$4 sm:$0xff]  }
 0x21c   :  { %3244 = vmatprep.subr.bf16.mxu0 %v777_v45 }
 0x21e   :  { %3213 = vmatpush3.bf16.msra.mxu1 %v769_v51 }
 0x21f   :  { %3245 = vmatpush3.bf16.msra.mxu0 %v777_v45  ;;  %3214 = vmatprep.subr.bf16.mxu1 %v770_v59 }
 0x220   :  { %3246 = vmatprep.subr.bf16.mxu0 %v778_v61 }
 0x222   :  { %3215 = vmatpush3.bf16.msra.mxu1 %v770_v59 }
 0x223   :  { %3247 = vmatpush3.bf16.msra.mxu0 %v778_v61  ;;  %3216 = vmatprep.subr.bf16.mxu1 %v771_v63 }
 0x224   :  { %3248 = vmatprep.subr.bf16.mxu0 %v779_v18 }
 0x226   :  { %3217 = vmatpush3.bf16.msra.mxu1 %v771_v63 }
 0x227   :  { %3249 = vmatpush3.bf16.msra.mxu0 %v779_v18  ;;  %3218 = vmatprep.subr.bf16.mxu1 %v772_v20 }
 0x228   :  { %3250 = vmatprep.subr.bf16.mxu0 %v780_v22 }
 0x22a   :  { %3219 = vmatpush3.bf16.msra.mxu1 %v772_v20 }
 0x22b   :  { %3251 = vmatpush3.bf16.msra.mxu0 %v780_v22  ;;  %3220 = vmatprep.subr.bf16.mxu1 %v773_v17  ;;  %v5046_v22 = vld [vmem:[#allocation8_spill] sm:$0xff] }
 0x22c   :  { %3252 = vmatprep.subr.bf16.mxu0 %v781_v24 }
 0x22e   :  { %3221 = vmatpush3.bf16.msra.mxu1 %v773_v17 }
 0x22f   :  { %3253 = vmatpush3.bf16.msra.mxu0 %v781_v24  ;;  %3222 = vmatprep.subr.bf16.mxu1 %v774_v26 }
 0x230   :  { %3254 = vmatprep.subr.bf16.mxu0 %v782_v28 }
 0x232   :  { %3223 = vmatpush3.bf16.msra.mxu1 %v774_v26 }
 0x233   :  { %3255 = vmatpush3.bf16.msra.mxu0 %v782_v28  ;;  %3272 = vmatprep.subr.bf16.mxu1 %v3545_v30 }
 0x234   :  { %3304 = vmatprep.subr.bf16.mxu0 %v3553_v35 }
 0x235   :  { %3225 = vmatmul.mubr.bf16.vlgmr.msra.gmra.mrb[32].mxu1 %v3755_v1 }
 0x236   :  { %3257 = vmatmul.mubr.bf16.vlgmr.msra.gmra.mrb[48].mxu0 %v3795_v9  ;;  %3228 = vmatprep.mubr.bf16.mxu1 %v3760_v2 }
 0x237   :  { %3260 = vmatprep.mubr.bf16.mxu0 %v3800_v10  ;;  %3273 = vmatpush3.bf16.msra.mxu1 %v3545_v30 }
 0x238   :  { %3274 = vmatprep.subr.bf16.mxu1 %v3546_v16  ;;  %3305 = vmatpush3.bf16.msra.mxu0 %v3553_v35 }
 0x239   :  { %3306 = vmatprep.subr.bf16.mxu0 %v3554_v36 }
 0x23b   :  { %3275 = vmatpush3.bf16.msra.mxu1 %v3546_v16 }
 0x23c   :  { %3276 = vmatprep.subr.bf16.mxu1 %v3547_v27  ;;  %3307 = vmatpush3.bf16.msra.mxu0 %v3554_v36  ;;  %v5047_v36 = vld [vmem:[#allocation13_spill] sm:$0xff] }
 0x23d   :  { %3229 = vmatmul.mubr.bf16.gmra.mrb[36].mxu1 %v3765_v3  ;;  %3308 = vmatprep.subr.bf16.mxu0 %v3555_v37 }
 0x23e   :  { %3261 = vmatmul.mubr.bf16.gmra.mrb[52].mxu0 %v3805_v11  ;;  %3232 = vmatprep.mubr.bf16.mxu1 %v3770_v4 }
 0x23f   :  { %3264 = vmatprep.mubr.bf16.mxu0 %v3810_v12  ;;  %3277 = vmatpush3.bf16.msra.mxu1 %v3547_v27 }
 0x240   :  { %3278 = vmatprep.subr.bf16.mxu1 %v3548_v29  ;;  %3309 = vmatpush3.bf16.msra.mxu0 %v3555_v37 }
 0x241   :  { %3310 = vmatprep.subr.bf16.mxu0 %v3556_v38 }
 0x243   :  { %3279 = vmatpush3.bf16.msra.mxu1 %v3548_v29 }
 0x244   :  { %3280 = vmatprep.subr.bf16.mxu1 %v3549_v31  ;;  %3311 = vmatpush3.bf16.msra.mxu0 %v3556_v38  ;;  %v5048_v38 = vld [vmem:[#allocation14_spill] sm:$0xff] }
 0x245   :  { %3233 = vmatmul.mubr.bf16.gmra.mrb[40].mxu1 %v3775_v5  ;;  %3312 = vmatprep.subr.bf16.mxu0 %v3557_v39 }
 0x246   :  { %3265 = vmatmul.mubr.bf16.gmra.mrb[56].mxu0 %v3815_v13  ;;  %3236 = vmatprep.mubr.bf16.mxu1 %v3780_v6 }
 0x247   :  { %3268 = vmatprep.mubr.bf16.mxu0 %v3820_v14  ;;  %3281 = vmatpush3.bf16.msra.mxu1 %v3549_v31 }
 0x248   :  { %3282 = vmatprep.subr.bf16.mxu1 %v3550_v32  ;;  %3313 = vmatpush3.bf16.msra.mxu0 %v3557_v39 }
 0x249   :  { %3314 = vmatprep.subr.bf16.mxu0 %v3558_v40 }
 0x24b   :  { %3283 = vmatpush3.bf16.msra.mxu1 %v3550_v32 }
 0x24c   :  { %3284 = vmatprep.subr.bf16.mxu1 %v3551_v33  ;;  %3315 = vmatpush3.bf16.msra.mxu0 %v3558_v40 }
 0x24d   :  { %3237 = vmatmul.mubr.bf16.gmra.mrb[44].mxu1 %v3785_v7 }
 0x24e   :  { %3269 = vmatmul.mubr.bf16.gmra.mrb[60].mxu0 %v3825_v15 }
 0x24f   :  { %3285 = vmatpush3.bf16.msra.mxu1 %v3551_v33 }
 0x250   :  { %3286 = vmatprep.subr.bf16.mxu1 %v3552_v34 }
 0x253   :  { %3287 = vmatpush3.bf16.msra.mxu1 %v3552_v34 }
 0x308   :  { %v3226_v41 = vpop.f32.mrb[32].mxu1 }
 0x309   :  { %v3258_v43 = vpop.f32.mrb[48].mxu0  ;;  %v890_v45 = vadd.f32 %v3226_v41, %v4000_v19  ;;  %v825_v47 = vpop.f32.mrb[33].mxu1 }
 0x30a   :  { %v1033_v46 = vadd.f32 %v3258_v43, %v4002_v21  ;;  %v968_v48 = vpop.f32.mrb[49].mxu0  ;;  %v888_v49 = vadd.f32 %v825_v47, %v3990_v58  ;;  %v3227_v51 = vpop.f32.mrb[34].mxu1 }
 0x30b   :  { %v1031_v50 = vadd.f32 %v968_v48, %v3994_v60  ;;  %v3259_v52 = vpop.f32.mrb[50].mxu0  ;;  %v911_v54 = vadd.f32 %v4118_v42, %v890_v45  ;;  %v891_v59 = vadd.f32 %v3227_v51, %v4004_v23  ;;  %v828_v63 = vpop.f32.mrb[35].mxu1  ;;  %v5050_v48 = vld [vmem:[#allocation10_spill] sm:$0xff] }
 0x30c   :  { %v1054_v56 = vadd.f32 %v4123_v44, %v1033_v46  ;;  %v1034_v61 = vadd.f32 %v3259_v52, %v4006_v25  ;;  %v971_v19 = vpop.f32.mrb[51].mxu0  ;;  %v909_v21 = vadd.f32 %v4118_v42, %v888_v49  ;;  %v889_v18 = vadd.f32 %v828_v63, %v3996_v62  ;;  %v5049_v46 = vld [vmem:[#allocation9_spill] sm:$0xff] }
 0x30d   :  { %vm1070_vm0 = vcmp.gt.f32.partialorder %v911_v54, 0.0  ;;  %v1086_v58 = vmul.f32 0.01, %v911_v54  ;;  %v1052_v20 = vadd.f32 %v4123_v44, %v1031_v50  ;;  %v1032_v17 = vadd.f32 %v971_v19, %v5046_v22 }
 0x30e   :  { %vm1118_vm1 = vcmp.gt.f32.partialorder %v1054_v56, 0.0  ;;  %v1134_v60 = vmul.f32 0.01, %v1054_v56  ;;  %v912_v23 = vadd.f32 %v4118_v42, %v891_v59  ;;  %v1055_v25 = vadd.f32 %v4123_v44, %v1034_v61  ;;  %v5052_v61 = vld [vmem:[#allocation16_spill] sm:$0xff] }
 0x30f   :  { %v1102_v24 = vsel %vm1070_vm0, %v911_v54, %v1086_v58  ;;  %vm1068_vm2 = vcmp.gt.f32.partialorder %v909_v21, 0.0  ;;  %v910_v30 = vadd.f32 %v4118_v42, %v889_v18  ;;  %v1084_v31 = vmul.f32 0.01, %v909_v21 }
 0x310   :  { %v1150_v26 = vsel %vm1118_vm1, %v1054_v56, %v1134_v60  ;;  %v3230_v62 = vpop.f32.mrb[36].mxu1  ;;  %vm1071_vm3 = vcmp.gt.f32.partialorder %v912_v23, 0.0  ;;  %v1087_v27 = vmul.f32 0.01, %v912_v23  ;;  %vm1119_vm4 = vcmp.gt.f32.partialorder %v1055_v25, 0.0  ;;  %v5051_v56 = vld [vmem:[#allocation15_spill] sm:$0xff] }
 0x311   :  { %v4139_v28 = vadd.f32 %v1150_v26, %v1102_v24  ;;  %v3262_v16 = vpop.f32.mrb[52].mxu0  ;;  %v1135_v29 = vmul.f32 0.01, %v1055_v25  ;;  %v1132_v32 = vmul.f32 0.01, %v1052_v20  ;;  %vm1069_vm5 = vcmp.gt.f32.partialorder %v910_v30, 0.0 }
 0x312   :  { %v1053_v33 = vadd.f32 %v4123_v44, %v1032_v17  ;;  %v1103_v34 = vsel %vm1071_vm3, %v912_v23, %v1087_v27  ;;  %v894_v37 = vadd.f32 %v3230_v62, %v5047_v36  ;;  %v1037_v39 = vadd.f32 %v3262_v16, %v5048_v38  ;;  %v841_v40 = vpop.f32.mrb[37].mxu1  ;;  %v984_v41 = vpop.f32.mrb[53].mxu0  ;;  %v5053_v17 = vld [vmem:[#allocation11_spill] sm:$0xff]  ;;  %v5054_v36 = vld [vmem:[#allocation12_spill] sm:$0xff] }
 0x313   :  { %v1151_v35 = vsel %vm1119_vm4, %v1055_v25, %v1135_v29  ;;  %v1085_v45 = vmul.f32 0.01, %v910_v30  ;;  %v892_v47 = vadd.f32 %v841_v40, %v5049_v46  ;;  %v1035_v49 = vadd.f32 %v984_v41, %v5050_v48  ;;  %v3231_v50 = vpop.f32.mrb[38].mxu1  ;;  %v3263_v51 = vpop.f32.mrb[54].mxu0  ;;  %v5055_v40 = vld [vmem:[#allocation21_spill] sm:$0xff]  ;;  %v5056_v46 = vld [vmem:[#allocation22_spill] sm:$0xff] }
 0x314   :  { %v4145_v43 = vadd.f32 %v1151_v35, %v1103_v34  ;;  %v4150_v52 = vadd.f32 %v4118_v42, %v894_v37  ;;  %v4153_v54 = vadd.f32 %v4123_v44, %v1037_v39  ;;  %v895_v59 = vadd.f32 %v3231_v50, %v5051_v56  ;;  %v844_v19 = vpop.f32.mrb[39].mxu1  ;;  %v987_v18 = vpop.f32.mrb[55].mxu0 }
 0x315   :  { %v1038_v63 = vadd.f32 %v3263_v51, %v5052_v61  ;;  %v1133_v60 = vmul.f32 0.01, %v1053_v33  ;;  %v913_v22 = vadd.f32 %v4118_v42, %v892_v47  ;;  %v893_v24 = vadd.f32 %v844_v19, %v5053_v17 }
 0x316   :  { %vm1116_vm6 = vcmp.gt.f32.partialorder %v1052_v20, 0.0  ;;  %vm1117_vm7 = vcmp.gt.f32.partialorder %v1053_v33, 0.0  ;;  %v4162_v26 = vadd.f32 %v4123_v44, %v1035_v49  ;;  %v1100_v23 = vsel %vm1068_vm2, %v909_v21, %v1084_v31 }
 0x317   :  { %v4166_v25 = vmul.f32 0.01, %v4150_v52  ;;  %v4169_v62 = vmul.f32 0.01, %v4153_v54  ;;  %v1088_v16 = vmul.f32 0.01, %v913_v22  ;;  %v1101_v27 = vsel %vm1069_vm5, %v910_v30, %v1085_v45 }
 0x318   :  { %v4173_v29 = vadd.f32 %v4118_v42, %v895_v59  ;;  %v4176_v34 = vadd.f32 %v4123_v44, %v1038_v63  ;;  %v4179_v35 = vadd.f32 %v4118_v42, %v893_v24  ;;  %v1036_v21 = vadd.f32 %v987_v18, %v5054_v36  ;;  %v3234_v31 = vpop.f32.mrb[40].mxu1  ;;  %v5057_v63 = vld [vmem:[#allocation17_spill] sm:$0xff]  ;;  %v5058_v24 = vld [vmem:[#allocation18_spill] sm:$0xff] }
 0x319   :  { %v3266_v37 = vpop.f32.mrb[56].mxu0  ;;  %v1148_v38 = vsel %vm1116_vm6, %v1052_v20, %v1132_v32  ;;  %v1149_v39 = vsel %vm1117_vm7, %v1053_v33, %v1133_v60  ;;  %v898_v41 = vadd.f32 %v3234_v31, %v5055_v40  ;;  %v857_v30 = vpop.f32.mrb[41].mxu1  ;;  %vm1072_vm8 = vcmp.gt.f32.partialorder %v913_v22, 0.0 }
 0x31a   :  { %v1041_v47 = vadd.f32 %v3266_v37, %v5056_v46  ;;  %v1000_v45 = vpop.f32.mrb[57].mxu0  ;;  %vm1120_vm9 = vcmp.gt.f32.partialorder %v4162_v26, 0.0  ;;  %v1136_v48 = vmul.f32 0.01, %v4162_v26  ;;  %v4187_v49 = vmul.f32 0.01, %v4173_v29 }
 0x31b   :  { %vm1074_vm10 = vcmp.gt.f32.partialorder %v4150_v52, 0.0  ;;  %vm1122_vm11 = vcmp.gt.f32.partialorder %v4153_v54, 0.0  ;;  %vm1075_vm12 = vcmp.gt.f32.partialorder %v4173_v29, 0.0  ;;  %vm1123_vm13 = vcmp.gt.f32.partialorder %v4176_v34, 0.0  ;;  %v3235_v50 = vpop.f32.mrb[42].mxu1  ;;  %v3267_v51 = vpop.f32.mrb[58].mxu0 }
 0x31c   :  { %v4194_v20 = vmul.f32 0.01, %v4176_v34  ;;  %v1057_v32 = vadd.f32 %v4123_v44, %v1036_v21  ;;  %v1164_v33 = vadd.f32 %v1148_v38, %v1100_v23  ;;  %v1165_v56 = vadd.f32 %v1149_v39, %v1101_v27  ;;  %v860_v18 = vpop.f32.mrb[43].mxu1  ;;  %v1003_v60 = vpop.f32.mrb[59].mxu0  ;;  %v5059_v23 = vld [vmem:[#allocation23_spill] sm:$0xff] }
 0x31d   :  { %v4198_v59 = vadd.f32 %v4118_v42, %v898_v41  ;;  %v4201_v61 = vadd.f32 %v4123_v44, %v1041_v47  ;;  %v896_v19 = vadd.f32 %v857_v30, %v5057_v63  ;;  %vm1073_vm14 = vcmp.gt.f32.partialorder %v4179_v35, 0.0  ;;  %v5060_v30 = vld [vmem:[#allocation24_spill] sm:$0xff] }
 0x31e   :  { %v1089_v17 = vmul.f32 0.01, %v4179_v35  ;;  %v1039_v36 = vadd.f32 %v1000_v45, %v5058_v24  ;;  %v899_v21 = vadd.f32 %v3235_v50, %v5059_v23  ;;  %vm1121_vm15 = vcmp.gt.f32.partialorder %v1057_v32, 0.0 }
 0x31f   :  { %v1137_v27 = vmul.f32 0.01, %v1057_v32  ;;  %v1180_v31 = vpack.c.bf16 %v1165_v56, %v1164_v33  ;;  %v1094_v37 = vmul.f32 0.01, %v4198_v59  ;;  %vm1078_vm0 = vcmp.gt.f32.partialorder %v4198_v59, 0.0  ;;  %v5061_v33 = vld [vmem:[#allocation19_spill] sm:$0xff] }
 0x320   :  { %vm1126_vm1 = vcmp.gt.f32.partialorder %v4201_v61, 0.0  ;;  %v1142_v38 = vmul.f32 0.01, %v4201_v61  ;;  %v917_v39 = vadd.f32 %v4118_v42, %v896_v19  ;;  %v1060_v40 = vadd.f32 %v4123_v44, %v1039_v36  ;;  %v3238_v46 = vpop.f32.mrb[44].mxu1  ;;  %v5062_v56 = vld [vmem:[#allocation20_spill] sm:$0xff] }
 0x321   :  { %v920_v41 = vadd.f32 %v4118_v42, %v899_v21  ;;  %v3270_v47 = vpop.f32.mrb[60].mxu0  ;;  %3288 = vmatprep.mubr.bf16.mxu1 %v1180_v31  ;;  %v1042_v45 = vadd.f32 %v3267_v51, %v5060_v30  ;;  %v897_v50 = vadd.f32 %v860_v18, %v5061_v33  ;;  %v1040_v63 = vadd.f32 %v1003_v60, %v5062_v56  ;;  %v873_v23 = vpop.f32.mrb[45].mxu1 }
 0x322   :  { %v1104_v24 = vsel %vm1072_vm8, %v913_v22, %v1088_v16  ;;  %v1016_v58 = vpop.f32.mrb[61].mxu0  ;;  %v5063_v19 = vpack.c.bf16 %v4145_v43, %v4139_v28  ;;  %vm1076_vm2 = vcmp.gt.f32.partialorder %v917_v39, 0.0  ;;  %v1092_v36 = vmul.f32 0.01, %v917_v39  ;;  %v3239_v30 = vpop.f32.mrb[46].mxu1 }
 0x323   :  { %vm1124_vm3 = vcmp.gt.f32.partialorder %v1060_v40, 0.0  ;;  %v1140_v21 = vmul.f32 0.01, %v1060_v40  ;;  %vm1079_vm4 = vcmp.gt.f32.partialorder %v920_v41, 0.0  ;;  %v1095_v31 = vmul.f32 0.01, %v920_v41 }
 0x324   :  { %3289 = vmatmul.mubr.bf16.vlgmr.msra.gmra.mrb[48].mxu1 %v5063_v19  ;;  %v1063_v51 = vadd.f32 %v4123_v44, %v1042_v45  ;;  %v918_v18 = vadd.f32 %v4118_v42, %v897_v50  ;;  %v3271_v60 = vpop.f32.mrb[62].mxu0  ;;  %v1061_v22 = vadd.f32 %v4123_v44, %v1040_v63  ;;  %v1105_v16 = vsel %vm1073_vm14, %v4179_v35, %v1089_v17  ;;  %v876_v33 = vpop.f32.mrb[47].mxu1 }
 0x325   :  { %v1152_v28 = vsel %vm1120_vm9, %v4162_v26, %v1136_v48  ;;  %v1153_v43 = vsel %vm1121_vm15, %v1057_v32, %v1137_v27  ;;  %v1019_v56 = vpop.f32.mrb[63].mxu0  ;;  %v1106_v35 = vsel %vm1074_vm10, %v4150_v52, %v4166_v25  ;;  %v1107_v26 = vsel %vm1075_vm12, %v4173_v29, %v4187_v49 }
 0x326   :  { %vm1127_vm5 = vcmp.gt.f32.partialorder %v1063_v51, 0.0  ;;  %v1143_v45 = vmul.f32 0.01, %v1063_v51  ;;  %vm1077_vm6 = vcmp.gt.f32.partialorder %v918_v18, 0.0  ;;  %v1093_v50 = vmul.f32 0.01, %v918_v18 }
 0x327   :  { %vm1125_vm7 = vcmp.gt.f32.partialorder %v1061_v22, 0.0  ;;  %v1141_v19 = vmul.f32 0.01, %v1061_v22  ;;  %v1168_v15 = vadd.f32 %v1152_v28, %v1104_v24  ;;  %v1169_v63 = vadd.f32 %v1153_v43, %v1105_v16 }
 0x328   :  { %v1154_v48 = vsel %vm1122_vm11, %v4153_v54, %v4169_v62  ;;  %v1155_v32 = vsel %vm1123_vm13, %v4176_v34, %v4194_v20  ;;  %v1108_v52 = vsel %vm1076_vm2, %v917_v39, %v1092_v36  ;;  %v1109_v25 = vsel %vm1077_vm6, %v918_v18, %v1093_v50  ;;  %v5064_v36 = vld [vmem:[#allocation25_spill] sm:$0xff]  ;;  %v5067_v50 = vld [vmem:[#allocation27_spill] sm:$0xff] }
 0x329   :  { %v1182_v17 = vpack.c.bf16 %v1169_v63, %v1168_v15  ;;  %v1170_v27 = vadd.f32 %v1154_v48, %v1106_v35  ;;  %v1171_v24 = vadd.f32 %v1155_v32, %v1107_v26  ;;  %v1156_v16 = vsel %vm1124_vm3, %v1060_v40, %v1140_v21  ;;  %v5066_v18 = vld [vmem:[#allocation29_spill] sm:$0xff]  ;;  %v5068_v63 = vld [vmem:[#allocation28_spill] sm:$0xff] }
 0x32a   :  { %v1157_v28 = vsel %vm1125_vm7, %v1061_v22, %v1141_v19  ;;  %v902_v29 = vadd.f32 %v3238_v46, %v4048_v53  ;;  %v1172_v43 = vadd.f32 %v1156_v16, %v1108_v52  ;;  %v1045_v62 = vadd.f32 %v3270_v47, %v4050_v55 }
 0x32b   :  { %3292 = vmatprep.mubr.bf16.mxu1 %v1182_v17  ;;  %v1183_v49 = vpack.c.bf16 %v1171_v24, %v1170_v27  ;;  %v1173_v54 = vadd.f32 %v1157_v28, %v1109_v25  ;;  %v1110_v15 = vsel %vm1078_vm0, %v4198_v59, %v1094_v37  ;;  %v1111_v34 = vsel %vm1079_vm4, %v920_v41, %v1095_v31  ;;  %v5065_v37 = vld [vmem:[#allocation26_spill] sm:$0xff] }
 0x32c   :  { %v923_v7 = vadd.f32 %v4118_v42, %v902_v29  ;;  %v1158_v20 = vsel %vm1126_vm1, %v4201_v61, %v1142_v38  ;;  %v1066_v39 = vadd.f32 %v4123_v44, %v1045_v62  ;;  %v1159_v40 = vsel %vm1127_vm5, %v1063_v51, %v1143_v45 }
 0x32d   :  { %3293 = vmatmul.mubr.bf16.gmra.mrb[52].mxu1 %v1183_v49  ;;  %v1184_v53 = vpack.c.bf16 %v1173_v54, %v1172_v43  ;;  %v1174_v46 = vadd.f32 %v1158_v20, %v1110_v15  ;;  %v1175_v47 = vadd.f32 %v1159_v40, %v1111_v34  ;;  %v900_v21 = vadd.f32 %v873_v23, %v5064_v36  ;;  %v3560_v15 = vld [vmem:[%s5012_s5 + $0x38] sm:$0xff]   ;;  %v3561_v34 = vld [vmem:[%s5013_s6] ss:$20 sps:$4 sm:$0xff]  }
 0x32e   :  { %vm1082_vm8 = vcmp.gt.f32.partialorder %v923_v7, 0.0  ;;  %v1098_v55 = vmul.f32 0.01, %v923_v7  ;;  %vm1130_vm9 = vcmp.gt.f32.partialorder %v1066_v39, 0.0  ;;  %v1146_v59 = vmul.f32 0.01, %v1066_v39 }
 0x32f   :  { %3296 = vmatprep.mubr.bf16.mxu1 %v1184_v53  ;;  %v1043_v41 = vadd.f32 %v1016_v58, %v5065_v37  ;;  %v903_v31 = vadd.f32 %v3239_v30, %v4052_v57  ;;  %v1185_v61 = vpack.c.bf16 %v1175_v47, %v1174_v46  ;;  %v921_v38 = vadd.f32 %v4118_v42, %v900_v21  ;;  %v3563_v20 = vld [vmem:[%s5013_s6 + $0x4] ss:$20 sps:$4 sm:$0xff]   ;;  %v3566_v53 = vld [vmem:[%s5013_s6 + $0xc] ss:$20 sps:$4 sm:$0xff]   ;;  %v3567_v40 = vld [vmem:[%s5013_s6 + $0x28] ss:$20 sps:$4 sm:$0xff]  }
 0x330   :  { %v1046_v22 = vadd.f32 %v3271_v60, %v5066_v18  ;;  %v901_v51 = vadd.f32 %v876_v33, %v5067_v50  ;;  %v1044_v23 = vadd.f32 %v1019_v56, %v5068_v63  ;;  %v1114_v35 = vsel %vm1082_vm8, %v923_v7, %v1098_v55  ;;  %1728 = vmatprep.subr.bf16.mxu1 %v3563_v20  ;;  %v3575_v46 = vld [vmem:[%s5013_s6 + $0x54] ss:$20 sps:$4 sm:$0xff]   ;;  %v3573_v55 = vld [vmem:[%s5013_s6 + $0x50] ss:$20 sps:$4 sm:$0xff]   ;;  %v3579_v36 = vld [vmem:[%s5013_s6 + $0x78] ss:$20 sps:$4 sm:$0xff]  }
 0x331   :  { %v1064_v45 = vadd.f32 %v4123_v44, %v1043_v41  ;;  %v924_v19 = vadd.f32 %v4118_v42, %v903_v31  ;;  %vm1080_vm10 = vcmp.gt.f32.partialorder %v921_v38, 0.0  ;;  %v1096_v26 = vmul.f32 0.01, %v921_v38  ;;  %1729 = vmatpush1.bf16.msra.mxu1 %v3561_v34  ;;  %v3581_v47 = vld [vmem:[%s5013_s6 + $0x7c] ss:$20 sps:$4 sm:$0xff]  }
 0x332   :  { %v1067_v58 = vadd.f32 %v4123_v44, %v1046_v22  ;;  %v922_v57 = vadd.f32 %v4118_v42, %v901_v51  ;;  %v1065_v32 = vadd.f32 %v4123_v44, %v1044_v23  ;;  %v1162_v52 = vsel %vm1130_vm9, %v1066_v39, %v1146_v59  ;;  %v3559_v44 = vld [vmem:[%s5012_s5 + $0x30] sm:$0xff]   ;;  %v3569_v39 = vld [vmem:[%s5013_s6 + $0x2c] ss:$20 sps:$4 sm:$0xff]   ;;  %v3587_v21 = vld [vmem:[%s5013_s6 + $0xa4] ss:$20 sps:$4 sm:$0xff]  }
 0x333   :  { %vm1128_vm11 = vcmp.gt.f32.partialorder %v1064_v45, 0.0  ;;  %v1144_v30 = vmul.f32 0.01, %v1064_v45  ;;  %vm1083_vm12 = vcmp.gt.f32.partialorder %v924_v19, 0.0  ;;  %v1099_v60 = vmul.f32 0.01, %v924_v19  ;;  %3316 = vmatprep.subr.bf16.mxu0 %v3559_v44  ;;  %1730 = vmatprep.subr.bf16.mxu1 %v3569_v39 }
 0x334   :  { %vm1131_vm13 = vcmp.gt.f32.partialorder %v1067_v58, 0.0  ;;  %v1147_v33 = vmul.f32 0.01, %v1067_v58  ;;  %vm1081_vm14 = vcmp.gt.f32.partialorder %v922_v57, 0.0  ;;  %v1097_v48 = vmul.f32 0.01, %v922_v57  ;;  %3317 = vmatpush3.bf16.msra.mxu0 %v3559_v44 }
 0x335   :  { %3297 = vmatmul.mubr.bf16.gmra.mrb[56].mxu1 %v1185_v61  ;;  %v1112_v56 = vsel %vm1080_vm10, %v921_v38, %v1096_v26  ;;  %v1160_v17 = vsel %vm1128_vm11, %v1064_v45, %v1144_v30  ;;  %v1115_v7 = vsel %vm1083_vm12, %v924_v19, %v1099_v60  ;;  %vm1129_vm15 = vcmp.gt.f32.partialorder %v1065_v32, 0.0  ;;  %3318 = vmatprep.subr.bf16.mxu0 %v3560_v15  ;;  %v3585_v59 = vld [vmem:[%s5013_s6 + $0xa0] ss:$20 sps:$4 sm:$0xff]   ;;  %v3591_v41 = vld [vmem:[%s5013_s6 + $0xc8] ss:$20 sps:$4 sm:$0xff]  }
 0x336   :  { %v1113_v27 = vsel %vm1081_vm14, %v922_v57, %v1097_v48  ;;  %v1176_v24 = vadd.f32 %v1160_v17, %v1112_v56  ;;  %v1163_v25 = vsel %vm1131_vm13, %v1067_v58, %v1147_v33  ;;  %v1145_v42 = vmul.f32 0.01, %v1065_v32  ;;  %1731 = vmatpush1.bf16.msra.mxu1 %v3567_v40  ;;  %v3593_v37 = vld [vmem:[%s5013_s6 + $0xcc] ss:$20 sps:$4 sm:$0xff]   ;;  %v3572_v26 = vld [vmem:[%s5013_s6 + $0x34] ss:$20 sps:$4 sm:$0xff]  }
 0x337   :  { %v1178_v16 = vadd.f32 %v1162_v52, %v1114_v35  ;;  %v1179_v28 = vadd.f32 %v1163_v25, %v1115_v7  ;;  %v5069_v62 = vmov 0   ;;  %1732 = vmatprep.subr.bf16.mxu1 %v3575_v46  ;;  %v4325_v61 = vld [vmem:[%s5011_s4 + $0x3] ss:$0 sm:$0xff]  ;;  %v3564_v35 = vld [vmem:[%s5013_s6 + $0x8] ss:$20 sps:$4 sm:$0xff]  }
 0x338   :  { %v1161_v29 = vsel %vm1129_vm15, %v1065_v32, %v1145_v42  ;;  %3319 = vmatpush3.bf16.msra.mxu0 %v3560_v15  ;;  %v3570_v57 = vld [vmem:[%s5013_s6 + $0x30] ss:$20 sps:$4 sm:$0xff]   ;;  %v3588_v20 = vld [vmem:[%s5013_s6 + $0xa8] ss:$20 sps:$4 sm:$0xff]  }
 0x339   :  { %v1187_v49 = vpack.c.bf16 %v1179_v28, %v1178_v16  ;;  %v1177_v43 = vadd.f32 %v1161_v29, %v1113_v27  ;;  %1841 = vmatprep.subr.bf16.mxu0 %v3566_v53  ;;  %v3578_v33 = vld [vmem:[%s5013_s6 + $0x5c] ss:$20 sps:$4 sm:$0xff]   ;;  %v3576_v27 = vld [vmem:[%s5013_s6 + $0x58] ss:$20 sps:$4 sm:$0xff]   ;;  %v3582_v16 = vld [vmem:[%s5013_s6 + $0x80] ss:$20 sps:$4 sm:$0xff]  }
 0x33a   :  { %1733 = vmatpush1.bf16.msra.mxu1 %v3573_v55  ;;  %v3584_v52 = vld [vmem:[%s5013_s6 + $0x84] ss:$20 sps:$4 sm:$0xff]   ;;  %v3596_v39 = vld [vmem:[%s5013_s6 + $0xd4] ss:$20 sps:$4 sm:$0xff]  }
 0x33b   :  { %v1186_v54 = vpack.c.bf16 %v1177_v43, %v1176_v24  ;;  %1734 = vmatprep.subr.bf16.mxu1 %v3581_v47  ;;  %v3594_v46 = vld [vmem:[%s5013_s6 + $0xd0] ss:$20 sps:$4 sm:$0xff]  }
 0x33d   :  { %3300 = vmatprep.mubr.bf16.mxu1 %v1186_v54 }
 0x33e   :  { %3301 = vmatmul.mubr.bf16.gmra.mrb[60].mxu1 %v1187_v49  ;;  %v3590_v49 = vld [vmem:[%s5013_s6 + $0xac] ss:$20 sps:$4 sm:$0xff]  }
 0x33f   :  { %1760 = vmatprep.mubr.bf16.mxu1 %v5069_v62  ;;  %1735 = vmatpush1.bf16.msra.mxu1 %v3579_v36 }
 0x340   :  { %1736 = vmatprep.subr.bf16.mxu1 %v3587_v21 }
 0x343   :  { %1737 = vmatpush1.bf16.msra.mxu1 %v3585_v59 }
 0x344   :  { %1738 = vmatprep.subr.bf16.mxu1 %v3593_v37 }
 0x347   :  { %1739 = vmatpush1.bf16.msra.mxu1 %v3591_v41 }
 0x3f7   :  { %v3290_v31 = vpop.f32.mrb[48].mxu1 }
 0x3f8   :  { %v1291_v38 = vpop.f32.mrb[49].mxu1  ;;  %v1300_v22 = vadd.f32 %v3290_v31, %v4325_v61 }
 0x3f9   :  { %v3291_v18 = vpop.f32.mrb[50].mxu1  ;;  %v1292_v45 = vadd.f32 %v4325_v61, %v1291_v38 }
 0x3fa   :  { %v1303_v50 = vadd.f32 %v3291_v18, %v4325_v61  ;;  %v1294_v51 = vpop.f32.mrb[51].mxu1 }
 0x3fb   :  { %v1295_v19 = vadd.f32 %v4325_v61, %v1294_v51  ;;  %v3597_v51 = vld [vmem:[%s5013_s6 + $0xf0] ss:$20 sps:$4 sm:$0xff]  }
 0x3fc   :  { %v1355_v63 = vpack.c.bf16 %v1303_v50, %v1300_v22  ;;  %v3599_v22 = vld [vmem:[%s5013_s6 + $0xf4] ss:$20 sps:$4 sm:$0xff]   ;;  %v3602_v50 = vld [vmem:[%s5013_s6 + $0xfc] ss:$20 sps:$4 sm:$0xff]  }
 0x3fd   :  { %v1354_v23 = vpack.c.bf16 %v1295_v19, %v1292_v45  ;;  %1740 = vmatprep.subr.bf16.mxu1 %v3599_v22  ;;  %v3605_v45 = vld [vmem:[%s5013_s6 + $0x11c] ss:$20 sps:$4 sm:$0xff]   ;;  %v3608_v19 = vld [vmem:[%s5013_s6 + $0x124] ss:$20 sps:$4 sm:$0xff]  }
 0x3fe   :  { %1741 = vmatpush1.bf16.msra.mxu1 %v3597_v51 }
 0x3ff   :  { %3320 = vmatprep.mubr.bf16.mxu0 %v1354_v23  ;;  %v3606_v23 = vld [vmem:[%s5013_s6 + $0x120] ss:$20 sps:$4 sm:$0xff]   ;;  %1742 = vmatprep.subr.bf16.mxu1 %v3605_v45 }
 0x400   :  { %3321 = vmatmul.mubr.bf16.vlgmr.msra.gmra.mrb[64].mxu0 %v1355_v63  ;;  %v3294_v58 = vpop.f32.mrb[52].mxu1  ;;  %v3603_v63 = vld [vmem:[%s5013_s6 + $0x118] ss:$20 sps:$4 sm:$0xff]  }
 0x401   :  { %1842 = vmatpush1.bf16.msra.mxu0 %v3564_v35  ;;  %v1316_v30 = vadd.f32 %v3294_v58, %v4325_v61  ;;  %v1307_v60 = vpop.f32.mrb[53].mxu1 }
 0x402   :  { %1843 = vmatprep.subr.bf16.mxu0 %v3572_v26  ;;  %v1308_v48 = vadd.f32 %v4325_v61, %v1307_v60  ;;  %v3295_v32 = vpop.f32.mrb[54].mxu1  ;;  %1743 = vmatpush1.bf16.msra.mxu1 %v3603_v63  ;;  %v2970_v26 = vld [vmem:[%s5014_s7] ss:$0 sm:$0xff] }
 0x403   :  { %v1319_v56 = vadd.f32 %v3295_v32, %v4325_v61  ;;  %v1310_v17 = vpop.f32.mrb[55].mxu1 }
 0x404   :  { %v1311_v7 = vadd.f32 %v4325_v61, %v1310_v17 }
 0x405   :  { %1844 = vmatpush1.bf16.msra.mxu0 %v3570_v57  ;;  %v1357_v24 = vpack.c.bf16 %v1319_v56, %v1316_v30 }
 0x406   :  { %1845 = vmatprep.subr.bf16.mxu0 %v3578_v33  ;;  %v1356_v25 = vpack.c.bf16 %v1311_v7, %v1308_v48 }
 0x408   :  { %3324 = vmatprep.mubr.bf16.mxu0 %v1356_v25  ;;  %v3298_v42 = vpop.f32.mrb[56].mxu1 }
 0x409   :  { %1846 = vmatpush1.bf16.msra.mxu0 %v3576_v27  ;;  %v1332_v28 = vadd.f32 %v3298_v42, %v4325_v61  ;;  %v1323_v29 = vpop.f32.mrb[57].mxu1 }
 0x40a   :  { %3325 = vmatmul.mubr.bf16.gmra.mrb[68].mxu0 %v1357_v24  ;;  %1847 = vmatprep.subr.bf16.mxu0 %v3584_v52  ;;  %v1324_v43 = vadd.f32 %v4325_v61, %v1323_v29  ;;  %v3299_v54 = vpop.f32.mrb[58].mxu1 }
 0x40b   :  { %v1335_v44 = vadd.f32 %v3299_v54, %v4325_v61  ;;  %v1326_v15 = vpop.f32.mrb[59].mxu1 }
 0x40c   :  { %v1327_v34 = vadd.f32 %v4325_v61, %v1326_v15 }
 0x40d   :  { %1848 = vmatpush1.bf16.msra.mxu0 %v3582_v16  ;;  %v1359_v53 = vpack.c.bf16 %v1335_v44, %v1332_v28 }
 0x40e   :  { %1849 = vmatprep.subr.bf16.mxu0 %v3590_v49  ;;  %v1358_v40 = vpack.c.bf16 %v1327_v34, %v1324_v43 }
 0x410   :  { %3328 = vmatprep.mubr.bf16.mxu0 %v1358_v40 }
 0x411   :  { %1850 = vmatpush1.bf16.msra.mxu0 %v3588_v20  ;;  %v3302_v55 = vpop.f32.mrb[60].mxu1 }
 0x412   :  { %3329 = vmatmul.mubr.bf16.gmra.mrb[72].mxu0 %v1359_v53  ;;  %1851 = vmatprep.subr.bf16.mxu0 %v3596_v39  ;;  %v1348_v47 = vadd.f32 %v3302_v55, %v4325_v61  ;;  %v1339_v36 = vpop.f32.mrb[61].mxu1 }
 0x413   :  { %v1340_v21 = vadd.f32 %v4325_v61, %v1339_v36  ;;  %v3303_v59 = vpop.f32.mrb[62].mxu1 }
 0x414   :  { %v1351_v37 = vadd.f32 %v3303_v59, %v4325_v61  ;;  %v1342_v41 = vpop.f32.mrb[63].mxu1 }
 0x415   :  { %1852 = vmatpush1.bf16.msra.mxu0 %v3594_v46  ;;  %v1343_v31 = vadd.f32 %v4325_v61, %v1342_v41  ;;  %v3600_v61 = vld [vmem:[%s5013_s6 + $0xf8] ss:$20 sps:$4 sm:$0xff]  }
 0x416   :  { %v1361_v38 = vpack.c.bf16 %v1351_v37, %v1348_v47  ;;  %1853 = vmatprep.subr.bf16.mxu0 %v3602_v50 }
 0x417   :  { %v1360_v18 = vpack.c.bf16 %v1343_v31, %v1340_v21 }
 0x419   :  { %3332 = vmatprep.mubr.bf16.mxu0 %v1360_v18  ;;  %1854 = vmatpush1.bf16.msra.mxu0 %v3600_v61 }
 0x41a   :  { %3333 = vmatmul.mubr.bf16.gmra.mrb[76].mxu0 %v1361_v38  ;;  %1855 = vmatprep.subr.bf16.mxu0 %v3608_v19 }
 0x41b   :  { %1873 = vmatprep.mubr.bf16.mxu0 %v5069_v62 }
 0x41d   :  { %1856 = vmatpush1.bf16.msra.mxu0 %v3606_v23 }
 0x4d3   :  { %v3322_v35 = vpop.f32.mrb[64].mxu0 }
 0x4d4   :  { %v1465_v58 = vpop.f32.mrb[65].mxu0  ;;  %v1474_v30 = vadd.f32 %v3322_v35, %v2970_v26 }
 0x4d5   :  { %v3323_v57 = vpop.f32.mrb[66].mxu0  ;;  %v1466_v48 = vadd.f32 %v2970_v26, %v1465_v58 }
 0x4d6   :  { %v1477_v60 = vadd.f32 %v3323_v57, %v2970_v26  ;;  %v1468_v33 = vpop.f32.mrb[67].mxu0 }
 0x4d7   :  { %v1469_v32 = vadd.f32 %v2970_v26, %v1468_v33 }
 0x4d8   :  { %v1529_v56 = vpack.c.bf16 %v1477_v60, %v1474_v30 }
 0x4d9   :  { %v1528_v17 = vpack.c.bf16 %v1469_v32, %v1466_v48 }
 0x4db   :  { %1761 = vmatmul.mubr.bf16.vlgmr.msra.gmra.mrb[64].mxu1 %v1528_v17  ;;  %1874 = vmatmul.mubr.bf16.vlgmr.msra.gmra.mrb[80].mxu0 %v1528_v17 }
 0x4dc   :  { %1770 = vmatprep.mubr.bf16.mxu1 %v5069_v62  ;;  %1883 = vmatprep.mubr.bf16.mxu0 %v5069_v62 }
 0x4dd   :  { %v3326_v7 = vpop.f32.mrb[68].mxu0 }
 0x4de   :  { %v1481_v27 = vpop.f32.mrb[69].mxu0  ;;  %v1490_v52 = vadd.f32 %v3326_v7, %v2970_v26 }
 0x4df   :  { %v3327_v24 = vpop.f32.mrb[70].mxu0  ;;  %v1482_v16 = vadd.f32 %v2970_v26, %v1481_v27 }
 0x4e0   :  { %v1493_v25 = vadd.f32 %v3327_v24, %v2970_v26  ;;  %v1484_v42 = vpop.f32.mrb[71].mxu0 }
 0x4e1   :  { %v1485_v28 = vadd.f32 %v2970_v26, %v1484_v42 }
 0x4e2   :  { %v1531_v29 = vpack.c.bf16 %v1493_v25, %v1490_v52 }
 0x4e3   :  { %v1530_v49 = vpack.c.bf16 %v1485_v28, %v1482_v16  ;;  %1771 = vmatmul.mubr.bf16.gmra.mrb[68].mxu1 %v1529_v56  ;;  %1884 = vmatmul.mubr.bf16.gmra.mrb[84].mxu0 %v1529_v56 }
 0x4e4   :  { %1780 = vmatprep.mubr.bf16.mxu1 %v5069_v62  ;;  %1893 = vmatprep.mubr.bf16.mxu0 %v5069_v62 }
 0x4e5   :  { %v3330_v43 = vpop.f32.mrb[72].mxu0 }
 0x4e6   :  { %v1506_v54 = vadd.f32 %v3330_v43, %v2970_v26  ;;  %v1497_v44 = vpop.f32.mrb[73].mxu0 }
 0x4e7   :  { %v1498_v15 = vadd.f32 %v2970_v26, %v1497_v44  ;;  %v3331_v34 = vpop.f32.mrb[74].mxu0 }
 0x4e8   :  { %v1509_v20 = vadd.f32 %v3331_v34, %v2970_v26  ;;  %v1500_v53 = vpop.f32.mrb[75].mxu0 }
 0x4e9   :  { %v1501_v39 = vadd.f32 %v2970_v26, %v1500_v53 }
 0x4ea   :  { %v1533_v40 = vpack.c.bf16 %v1509_v20, %v1506_v54 }
 0x4eb   :  { %v1532_v46 = vpack.c.bf16 %v1501_v39, %v1498_v15  ;;  %1781 = vmatmul.mubr.bf16.gmra.mrb[72].mxu1 %v1530_v49  ;;  %1894 = vmatmul.mubr.bf16.gmra.mrb[88].mxu0 %v1530_v49 }
 0x4ec   :  { %1790 = vmatprep.mubr.bf16.mxu1 %v5069_v62  ;;  %1903 = vmatprep.mubr.bf16.mxu0 %v5069_v62 }
 0x4ed   :  { %v3334_v55 = vpop.f32.mrb[76].mxu0 }
 0x4ee   :  { %v1522_v47 = vadd.f32 %v3334_v55, %v2970_v26  ;;  %v1513_v36 = vpop.f32.mrb[77].mxu0 }
 0x4ef   :  { %v1514_v21 = vadd.f32 %v2970_v26, %v1513_v36  ;;  %v3335_v59 = vpop.f32.mrb[78].mxu0 }
 0x4f0   :  { %v1525_v37 = vadd.f32 %v3335_v59, %v2970_v26  ;;  %v1516_v41 = vpop.f32.mrb[79].mxu0 }
 0x4f1   :  { %v1517_v31 = vadd.f32 %v2970_v26, %v1516_v41 }
 0x4f2   :  { %v1535_v38 = vpack.c.bf16 %v1525_v37, %v1522_v47 }
 0x4f3   :  { %1791 = vmatmul.mubr.bf16.gmra.mrb[76].mxu1 %v1531_v29  ;;  %1904 = vmatmul.mubr.bf16.gmra.mrb[92].mxu0 %v1531_v29  ;;  %v1534_v18 = vpack.c.bf16 %v1517_v31, %v1514_v21 }
 0x4f4   :  { %1800 = vmatprep.mubr.bf16.mxu1 %v5069_v62  ;;  %1913 = vmatprep.mubr.bf16.mxu0 %v5069_v62 }
 0x4fb   :  { %1801 = vmatmul.mubr.bf16.gmra.mrb[80].mxu1 %v1532_v46  ;;  %1914 = vmatmul.mubr.bf16.gmra.mrb[96].mxu0 %v1532_v46 }
 0x4fc   :  { %1810 = vmatprep.mubr.bf16.mxu1 %v5069_v62  ;;  %1923 = vmatprep.mubr.bf16.mxu0 %v5069_v62 }
 0x503   :  { %1811 = vmatmul.mubr.bf16.gmra.mrb[84].mxu1 %v1533_v40  ;;  %1924 = vmatmul.mubr.bf16.gmra.mrb[100].mxu0 %v1533_v40 }
 0x504   :  { %1820 = vmatprep.mubr.bf16.mxu1 %v5069_v62  ;;  %1933 = vmatprep.mubr.bf16.mxu0 %v5069_v62 }
 0x50b   :  { %1821 = vmatmul.mubr.bf16.gmra.mrb[88].mxu1 %v1534_v18  ;;  %1934 = vmatmul.mubr.bf16.gmra.mrb[104].mxu0 %v1534_v18 }
 0x50c   :  { %1830 = vmatprep.mubr.bf16.mxu1 %v5069_v62  ;;  %1943 = vmatprep.mubr.bf16.mxu0 %v5069_v62 }
 0x513   :  { %1831 = vmatmul.mubr.bf16.gmra.mrb[92].mxu1 %v1535_v38  ;;  %1944 = vmatmul.mubr.bf16.gmra.mrb[108].mxu0 %v1535_v38 }
 0x514   :  { %3352 = vmatprep.mubr.bf16.mxu1 %v3750_v0  ;;  %3384 = vmatprep.mubr.bf16.mxu0 %v3790_v8 }
 0x5ae   :  { %v4420_v22 = vpop.f32.mrb[64].mxu1  ;;  %v1875_v50 = vpop.f32.mrb[80].mxu0 }
 0x5af   :  { %v4422_v51 = vpop.f32.mrb[65].mxu1  ;;  %v1877_v61 = vpop.f32.mrb[81].mxu0 }
 0x5b0   :  { %v4424_v45 = vpop.f32.mrb[66].mxu1  ;;  %v1879_v19 = vpop.f32.mrb[82].mxu0 }
 0x5b1   :  { %v1954_v63 = vpack.c.bf16 %v1879_v19, %v1875_v50  ;;  %v4426_v23 = vpop.f32.mrb[67].mxu1  ;;  %v1881_v35 = vpop.f32.mrb[83].mxu0 }
 0x5b2   :  { %v1962_v62 = vpack.c.bf16 %v1881_v35, %v1877_v61 }
 0x5b3   :  { %3336 = vmatprep.subr.bf16.mxu1 %v1954_v63 }
 0x5b4   :  { %3337 = vmatpush3.bf16.msra.mxu1 %v1954_v63  ;;  %3368 = vmatprep.subr.bf16.mxu0 %v1962_v62 }
 0x5b5   :  { %3369 = vmatpush3.bf16.msra.mxu0 %v1962_v62 }
 0x5b6   :  { %v4428_v0 = vpop.f32.mrb[68].mxu1  ;;  %v1885_v8 = vpop.f32.mrb[84].mxu0 }
 0x5b7   :  { %v4430_v26 = vpop.f32.mrb[69].mxu1  ;;  %v1887_v58 = vpop.f32.mrb[85].mxu0 }
 0x5b8   :  { %v4432_v57 = vpop.f32.mrb[70].mxu1  ;;  %v1889_v30 = vpop.f32.mrb[86].mxu0 }
 0x5b9   :  { %v1955_v60 = vpack.c.bf16 %v1889_v30, %v1885_v8  ;;  %v4434_v33 = vpop.f32.mrb[71].mxu1  ;;  %v1891_v48 = vpop.f32.mrb[87].mxu0 }
 0x5ba   :  { %v1963_v32 = vpack.c.bf16 %v1891_v48, %v1887_v58 }
 0x5bb   :  { %3338 = vmatprep.subr.bf16.mxu1 %v1955_v60 }
 0x5bc   :  { %3339 = vmatpush3.bf16.msra.mxu1 %v1955_v60  ;;  %3370 = vmatprep.subr.bf16.mxu0 %v1963_v32 }
 0x5bd   :  { %3371 = vmatpush3.bf16.msra.mxu0 %v1963_v32 }
 0x5be   :  { %v4436_v56 = vpop.f32.mrb[72].mxu1  ;;  %v1895_v17 = vpop.f32.mrb[88].mxu0 }
 0x5bf   :  { %v4438_v7 = vpop.f32.mrb[73].mxu1  ;;  %v1897_v27 = vpop.f32.mrb[89].mxu0 }
 0x5c0   :  { %v4440_v24 = vpop.f32.mrb[74].mxu1  ;;  %v1899_v52 = vpop.f32.mrb[90].mxu0 }
 0x5c1   :  { %v1956_v25 = vpack.c.bf16 %v1899_v52, %v1895_v17  ;;  %v4442_v42 = vpop.f32.mrb[75].mxu1  ;;  %v1901_v16 = vpop.f32.mrb[91].mxu0 }
 0x5c2   :  { %v1964_v28 = vpack.c.bf16 %v1901_v16, %v1897_v27 }
 0x5c3   :  { %3340 = vmatprep.subr.bf16.mxu1 %v1956_v25 }
 0x5c4   :  { %3341 = vmatpush3.bf16.msra.mxu1 %v1956_v25  ;;  %3372 = vmatprep.subr.bf16.mxu0 %v1964_v28 }
 0x5c5   :  { %3373 = vmatpush3.bf16.msra.mxu0 %v1964_v28 }
 0x5c6   :  { %v4444_v29 = vpop.f32.mrb[76].mxu1  ;;  %v1905_v49 = vpop.f32.mrb[92].mxu0 }
 0x5c7   :  { %v4446_v43 = vpop.f32.mrb[77].mxu1  ;;  %v1907_v54 = vpop.f32.mrb[93].mxu0 }
 0x5c8   :  { %v4448_v44 = vpop.f32.mrb[78].mxu1  ;;  %v1909_v15 = vpop.f32.mrb[94].mxu0 }
 0x5c9   :  { %v1957_v34 = vpack.c.bf16 %v1909_v15, %v1905_v49  ;;  %v4450_v20 = vpop.f32.mrb[79].mxu1  ;;  %v1911_v53 = vpop.f32.mrb[95].mxu0 }
 0x5ca   :  { %v1965_v39 = vpack.c.bf16 %v1911_v53, %v1907_v54 }
 0x5cb   :  { %3342 = vmatprep.subr.bf16.mxu1 %v1957_v34 }
 0x5cc   :  { %3343 = vmatpush3.bf16.msra.mxu1 %v1957_v34  ;;  %3374 = vmatprep.subr.bf16.mxu0 %v1965_v39 }
 0x5cd   :  { %3375 = vmatpush3.bf16.msra.mxu0 %v1965_v39 }
 0x5ce   :  { %v4452_v40 = vpop.f32.mrb[80].mxu1  ;;  %v1915_v46 = vpop.f32.mrb[96].mxu0 }
 0x5cf   :  { %v4454_v55 = vpop.f32.mrb[81].mxu1  ;;  %v1917_v47 = vpop.f32.mrb[97].mxu0 }
 0x5d0   :  { %v4456_v36 = vpop.f32.mrb[82].mxu1  ;;  %v1919_v21 = vpop.f32.mrb[98].mxu0 }
 0x5d1   :  { %v1958_v59 = vpack.c.bf16 %v1919_v21, %v1915_v46  ;;  %v4458_v37 = vpop.f32.mrb[83].mxu1  ;;  %v1921_v41 = vpop.f32.mrb[99].mxu0 }
 0x5d2   :  { %v1966_v31 = vpack.c.bf16 %v1921_v41, %v1917_v47 }
 0x5d3   :  { %3344 = vmatprep.subr.bf16.mxu1 %v1958_v59 }
 0x5d4   :  { %3345 = vmatpush3.bf16.msra.mxu1 %v1958_v59  ;;  %3376 = vmatprep.subr.bf16.mxu0 %v1966_v31  ;;  %v3609_v59 = vld [vmem:[%s5013_s6 + $0x10] ss:$20 sps:$4 sm:$0xff]  }
 0x5d5   :  { %3377 = vmatpush3.bf16.msra.mxu0 %v1966_v31  ;;  %v3610_v31 = vld [vmem:[%s5013_s6 + $0x38] ss:$20 sps:$4 sm:$0xff]  }
 0x5d6   :  { %v4460_v38 = vpop.f32.mrb[84].mxu1  ;;  %v1925_v18 = vpop.f32.mrb[100].mxu0 }
 0x5d7   :  { %v4462_v50 = vpop.f32.mrb[85].mxu1  ;;  %v1927_v61 = vpop.f32.mrb[101].mxu0 }
 0x5d8   :  { %v4464_v19 = vpop.f32.mrb[86].mxu1  ;;  %v1929_v63 = vpop.f32.mrb[102].mxu0 }
 0x5d9   :  { %v1959_v35 = vpack.c.bf16 %v1929_v63, %v1925_v18  ;;  %v4466_v62 = vpop.f32.mrb[87].mxu1  ;;  %v1931_v8 = vpop.f32.mrb[103].mxu0  ;;  %v3611_v18 = vld [vmem:[%s5013_s6 + $0x60] ss:$20 sps:$4 sm:$0xff]  }
 0x5da   :  { %v1967_v58 = vpack.c.bf16 %v1931_v8, %v1927_v61  ;;  %v3612_v61 = vld [vmem:[%s5013_s6 + $0x88] ss:$20 sps:$4 sm:$0xff]  }
 0x5db   :  { %3346 = vmatprep.subr.bf16.mxu1 %v1959_v35 }
 0x5dc   :  { %3347 = vmatpush3.bf16.msra.mxu1 %v1959_v35  ;;  %3378 = vmatprep.subr.bf16.mxu0 %v1967_v58  ;;  %v4568_v35 = vld [vmem:[%s5014_s7 + $0x1] ss:$0 sm:$0xff] }
 0x5dd   :  { %3379 = vmatpush3.bf16.msra.mxu0 %v1967_v58 }
 0x5de   :  { %v4468_v30 = vpop.f32.mrb[88].mxu1  ;;  %v1935_v60 = vpop.f32.mrb[104].mxu0 }
 0x5df   :  { %v4470_v48 = vpop.f32.mrb[89].mxu1  ;;  %v1937_v32 = vpop.f32.mrb[105].mxu0 }
 0x5e0   :  { %v4472_v17 = vpop.f32.mrb[90].mxu1  ;;  %v1939_v27 = vpop.f32.mrb[106].mxu0 }
 0x5e1   :  { %v1960_v52 = vpack.c.bf16 %v1939_v27, %v1935_v60  ;;  %v4474_v25 = vpop.f32.mrb[91].mxu1  ;;  %v1941_v16 = vpop.f32.mrb[107].mxu0 }
 0x5e2   :  { %v1968_v28 = vpack.c.bf16 %v1941_v16, %v1937_v32  ;;  %v4574_v32 = vld [vmem:[%s5014_s7 + $0x2] ss:$0 sm:$0xff] }
 0x5e3   :  { %3348 = vmatprep.subr.bf16.mxu1 %v1960_v52 }
 0x5e4   :  { %3349 = vmatpush3.bf16.msra.mxu1 %v1960_v52  ;;  %3380 = vmatprep.subr.bf16.mxu0 %v1968_v28 }
 0x5e5   :  { %3381 = vmatpush3.bf16.msra.mxu0 %v1968_v28 }
 0x5e6   :  { %v4476_v49 = vpop.f32.mrb[92].mxu1  ;;  %v1945_v54 = vpop.f32.mrb[108].mxu0 }
 0x5e7   :  { %v4478_v15 = vpop.f32.mrb[93].mxu1  ;;  %v1947_v34 = vpop.f32.mrb[109].mxu0 }
 0x5e8   :  { %v4480_v53 = vpop.f32.mrb[94].mxu1  ;;  %v1949_v39 = vpop.f32.mrb[110].mxu0 }
 0x5e9   :  { %v1961_v46 = vpack.c.bf16 %v1949_v39, %v1945_v54  ;;  %v4482_v47 = vpop.f32.mrb[95].mxu1  ;;  %v1951_v21 = vpop.f32.mrb[111].mxu0 }
 0x5ea   :  { %v1969_v41 = vpack.c.bf16 %v1951_v21, %v1947_v34 }
 0x5eb   :  { %3350 = vmatprep.subr.bf16.mxu1 %v1961_v46 }
 0x5ec   :  { %3351 = vmatpush3.bf16.msra.mxu1 %v1961_v46  ;;  %3382 = vmatprep.subr.bf16.mxu0 %v1969_v41 }
 0x5ed   :  { %3383 = vmatpush3.bf16.msra.mxu0 %v1969_v41  ;;  %3400 = vmatprep.subr.bf16.mxu1 %v3609_v59 }
 0x5ef   :  { %3353 = vmatmul.mubr.bf16.vlgmr.msra.gmra.mrb[96].mxu1 %v3755_v1  ;;  %v5070_v1 = vld [vmem:[#allocation6_spill] sm:$0xff] }
 0x5f0   :  { %3385 = vmatmul.mubr.bf16.vlgmr.msra.gmra.mrb[112].mxu0 %v3795_v9  ;;  %3356 = vmatprep.mubr.bf16.mxu1 %v3760_v2  ;;  %v5071_v2 = vld [vmem:[#allocation7_spill] sm:$0xff]  ;;  %v4525_v9 = vld [vmem:[%s5015_s8] sm:$0xff]  }
 0x5f1   :  { %3388 = vmatprep.mubr.bf16.mxu0 %v3800_v10  ;;  %3401 = vmatpush3.bf16.msra.mxu1 %v3609_v59  ;;  %v4530_v10 = vld [vmem:[%s5015_s8 + $0x8] sm:$0xff]  }
 0x5f2   :  { %3402 = vmatprep.subr.bf16.mxu1 %v3610_v31  ;;  %3432 = vmatprep.subr.bf16.mxu0 %v4525_v9 }
 0x5f3   :  { %3433 = vmatpush3.bf16.msra.mxu0 %v4525_v9 }
 0x5f4   :  { %3434 = vmatprep.subr.bf16.mxu0 %v4530_v10 }
 0x5f5   :  { %3403 = vmatpush3.bf16.msra.mxu1 %v3610_v31 }
 0x5f6   :  { %3404 = vmatprep.subr.bf16.mxu1 %v3611_v18 }
 0x5f7   :  { %3357 = vmatmul.mubr.bf16.gmra.mrb[100].mxu1 %v3765_v3  ;;  %v3613_v3 = vld [vmem:[%s5013_s6 + $0xb0] ss:$20 sps:$4 sm:$0xff]   ;;  %3435 = vmatpush3.bf16.msra.mxu0 %v4530_v10 }
 0x5f8   :  { %3389 = vmatmul.mubr.bf16.gmra.mrb[116].mxu0 %v3805_v11  ;;  %3360 = vmatprep.mubr.bf16.mxu1 %v3770_v4  ;;  %v3614_v4 = vld [vmem:[%s5013_s6 + $0xd8] ss:$20 sps:$4 sm:$0xff]   ;;  %v4539_v11 = vld [vmem:[%s5015_s8 + $0x10] sm:$0xff]  }
 0x5f9   :  { %3392 = vmatprep.mubr.bf16.mxu0 %v3810_v12  ;;  %3405 = vmatpush3.bf16.msra.mxu1 %v3611_v18  ;;  %v4546_v12 = vld [vmem:[%s5015_s8 + $0x18] sm:$0xff]  }
 0x5fa   :  { %3406 = vmatprep.subr.bf16.mxu1 %v3612_v61  ;;  %3436 = vmatprep.subr.bf16.mxu0 %v4539_v11 }
 0x5fb   :  { %3437 = vmatpush3.bf16.msra.mxu0 %v4539_v11 }
 0x5fc   :  { %3438 = vmatprep.subr.bf16.mxu0 %v4546_v12 }
 0x5fd   :  { %3407 = vmatpush3.bf16.msra.mxu1 %v3612_v61 }
 0x5fe   :  { %3408 = vmatprep.subr.bf16.mxu1 %v3613_v3 }
 0x5ff   :  { %3361 = vmatmul.mubr.bf16.gmra.mrb[104].mxu1 %v3775_v5  ;;  %v3615_v5 = vld [vmem:[%s5013_s6 + $0x100] ss:$20 sps:$4 sm:$0xff]   ;;  %3439 = vmatpush3.bf16.msra.mxu0 %v4546_v12 }
 0x600   :  { %3393 = vmatmul.mubr.bf16.gmra.mrb[120].mxu0 %v3815_v13  ;;  %3364 = vmatprep.mubr.bf16.mxu1 %v3780_v6  ;;  %v3616_v6 = vld [vmem:[%s5013_s6 + $0x128] ss:$20 sps:$4 sm:$0xff]   ;;  %v4553_v13 = vld [vmem:[%s5015_s8 + $0x20] sm:$0xff]  }
 0x601   :  { %3396 = vmatprep.mubr.bf16.mxu0 %v3820_v14  ;;  %3409 = vmatpush3.bf16.msra.mxu1 %v3613_v3  ;;  %v4560_v14 = vld [vmem:[%s5015_s8 + $0x28] sm:$0xff]  }
 0x602   :  { %3410 = vmatprep.subr.bf16.mxu1 %v3614_v4  ;;  %3440 = vmatprep.subr.bf16.mxu0 %v4553_v13 }
 0x603   :  { %3441 = vmatpush3.bf16.msra.mxu0 %v4553_v13 }
 0x604   :  { %3442 = vmatprep.subr.bf16.mxu0 %v4560_v14 }
 0x605   :  { %3411 = vmatpush3.bf16.msra.mxu1 %v3614_v4 }
 0x606   :  { %3412 = vmatprep.subr.bf16.mxu1 %v3615_v5 }
 0x607   :  { %3365 = vmatmul.mubr.bf16.gmra.mrb[108].mxu1 %v5070_v1  ;;  %3443 = vmatpush3.bf16.msra.mxu0 %v4560_v14 }
 0x608   :  { %3397 = vmatmul.mubr.bf16.gmra.mrb[124].mxu0 %v5071_v2 }
 0x609   :  { %3413 = vmatpush3.bf16.msra.mxu1 %v3615_v5 }
 0x60a   :  { %3414 = vmatprep.subr.bf16.mxu1 %v3616_v6 }
 0x60d   :  { %3415 = vmatpush3.bf16.msra.mxu1 %v3616_v6 }
 0x60e   :  { %3464 = vmatprep.subr.bf16.mxu1 %v4525_v9 }
 0x6c2   :  { %v3354_v63 = vpop.f32.mrb[96].mxu1 }
 0x6c3   :  { %v2069_v8 = vadd.f32 %v3354_v63, %v4428_v0  ;;  %v2004_v58 = vpop.f32.mrb[97].mxu1  ;;  %v3386_v60 = vpop.f32.mrb[112].mxu0 }
 0x6c4   :  { %v2067_v27 = vadd.f32 %v2004_v58, %v4420_v22  ;;  %v2203_v52 = vadd.f32 %v3386_v60, %v4430_v26  ;;  %v3355_v16 = vpop.f32.mrb[98].mxu1  ;;  %v2138_v28 = vpop.f32.mrb[113].mxu0 }
 0x6c5   :  { %v2090_v54 = vadd.f32 %v4568_v35, %v2069_v8  ;;  %v2070_v34 = vadd.f32 %v3355_v16, %v4432_v57  ;;  %v2201_v39 = vadd.f32 %v2138_v28, %v4422_v51  ;;  %v2007_v0 = vpop.f32.mrb[99].mxu1  ;;  %v3387_v46 = vpop.f32.mrb[114].mxu0 }
 0x6c6   :  { %v2224_v21 = vadd.f32 %v4574_v32, %v2203_v52  ;;  %v2068_v59 = vadd.f32 %v2007_v0, %v4424_v45  ;;  %v2204_v41 = vadd.f32 %v3387_v46, %v4434_v33  ;;  %v2141_v31 = vpop.f32.mrb[115].mxu0  ;;  %v2088_v51 = vadd.f32 %v4568_v35, %v2067_v27 }
 0x6c7   :  { %vm2240_vm0 = vcmp.gt.f32.partialorder %v2090_v54, 0.0  ;;  %v2256_v22 = vmul.f32 0.01, %v2090_v54  ;;  %v2091_v26 = vadd.f32 %v4568_v35, %v2070_v34  ;;  %v2222_v45 = vadd.f32 %v4574_v32, %v2201_v39 }
 0x6c8   :  { %vm2288_vm1 = vcmp.gt.f32.partialorder %v2224_v21, 0.0  ;;  %v2304_v18 = vmul.f32 0.01, %v2224_v21  ;;  %v2225_v2 = vadd.f32 %v4574_v32, %v2204_v41  ;;  %v2202_v33 = vadd.f32 %v2141_v31, %v4426_v23 }
 0x6c9   :  { %v2272_v61 = vsel %vm2240_vm0, %v2090_v54, %v2256_v22  ;;  %vm2241_vm2 = vcmp.gt.f32.partialorder %v2091_v26, 0.0  ;;  %v2257_v57 = vmul.f32 0.01, %v2091_v26  ;;  %v2089_v58 = vadd.f32 %v4568_v35, %v2068_v59 }
 0x6ca   :  { %v2320_v1 = vsel %vm2288_vm1, %v2224_v21, %v2304_v18  ;;  %v3358_v3 = vpop.f32.mrb[100].mxu1  ;;  %vm2289_vm3 = vcmp.gt.f32.partialorder %v2225_v2, 0.0  ;;  %v2305_v60 = vmul.f32 0.01, %v2225_v2  ;;  %v2223_v27 = vadd.f32 %v4574_v32, %v2202_v33 }
 0x6cb   :  { %v4587_v4 = vadd.f32 %v2320_v1, %v2272_v61  ;;  %v2073_v5 = vadd.f32 %v3358_v3, %v4444_v29  ;;  %v2020_v6 = vpop.f32.mrb[101].mxu1  ;;  %v3390_v63 = vpop.f32.mrb[116].mxu0  ;;  %v2273_v8 = vsel %vm2241_vm2, %v2091_v26, %v2257_v57  ;;  %vm2238_vm4 = vcmp.gt.f32.partialorder %v2088_v51, 0.0 }
 0x6cc   :  { %v2071_v52 = vadd.f32 %v2020_v6, %v4436_v56  ;;  %v2207_v16 = vadd.f32 %v3390_v63, %v4446_v43  ;;  %v3359_v28 = vpop.f32.mrb[102].mxu1  ;;  %v2154_v54 = vpop.f32.mrb[117].mxu0  ;;  %v2321_v34 = vsel %vm2289_vm3, %v2225_v2, %v2305_v60  ;;  %v2254_v46 = vmul.f32 0.01, %v2088_v51 }
 0x6cd   :  { %v2074_v23 = vadd.f32 %v3359_v28, %v4448_v44  ;;  %v2205_v29 = vadd.f32 %v2154_v54, %v4438_v7  ;;  %v2023_v39 = vpop.f32.mrb[103].mxu1  ;;  %v3391_v0 = vpop.f32.mrb[118].mxu0  ;;  %vm2286_vm5 = vcmp.gt.f32.partialorder %v2222_v45, 0.0  ;;  %v4598_v21 = vadd.f32 %v2321_v34, %v2273_v8 }
 0x6ce   :  { %v4601_v59 = vadd.f32 %v4568_v35, %v2073_v5  ;;  %v2157_v56 = vpop.f32.mrb[119].mxu0  ;;  %v2302_v41 = vmul.f32 0.01, %v2222_v45  ;;  %vm2239_vm6 = vcmp.gt.f32.partialorder %v2089_v58, 0.0  ;;  %v2255_v43 = vmul.f32 0.01, %v2089_v58 }
 0x6cf   :  { %v4604_v31 = vadd.f32 %v4568_v35, %v2071_v52  ;;  %v2351_v44 = vpack.c.bf16 %v4598_v21, %v4587_v4  ;;  %v2303_v7 = vmul.f32 0.01, %v2223_v27  ;;  %v2072_v22 = vadd.f32 %v2023_v39, %v4440_v24 }
 0x6d0   :  { %v2208_v26 = vadd.f32 %v3391_v0, %v4450_v20  ;;  %vm2287_vm7 = vcmp.gt.f32.partialorder %v2223_v27, 0.0  ;;  %v4611_v18 = vadd.f32 %v4574_v32, %v2207_v16  ;;  %v4614_v61 = vadd.f32 %v4568_v35, %v2074_v23 }
 0x6d1   :  { %v4617_v57 = vadd.f32 %v4574_v32, %v2205_v29  ;;  %v4620_v1 = vmul.f32 0.01, %v4601_v59  ;;  %v4623_v2 = vmul.f32 0.01, %v4604_v31  ;;  %v2270_v24 = vsel %vm2238_vm4, %v2088_v51, %v2254_v46 }
 0x6d2   :  { %vm2242_vm8 = vcmp.gt.f32.partialorder %v4604_v31, 0.0  ;;  %v4628_v20 = vadd.f32 %v4568_v35, %v2072_v22  ;;  %v4631_v3 = vadd.f32 %v4574_v32, %v2208_v26  ;;  %v2206_v33 = vadd.f32 %v2157_v56, %v4442_v42  ;;  %v3362_v5 = vpop.f32.mrb[104].mxu1 }
 0x6d3   :  { %v2271_v6 = vsel %vm2239_vm6, %v2089_v58, %v2255_v43  ;;  %v3394_v63 = vpop.f32.mrb[120].mxu0  ;;  %v2077_v8 = vadd.f32 %v3362_v5, %v4460_v38  ;;  %v2318_v60 = vsel %vm2286_vm5, %v2222_v45, %v2302_v41  ;;  %v2319_v51 = vsel %vm2287_vm7, %v2223_v27, %v2303_v7  ;;  %v2036_v52 = vpop.f32.mrb[105].mxu1 }
 0x6d4   :  { %v2211_v16 = vadd.f32 %v3394_v63, %v4462_v50  ;;  %v2170_v28 = vpop.f32.mrb[121].mxu0  ;;  %v4640_v54 = vmul.f32 0.01, %v4611_v18  ;;  %v4643_v34 = vmul.f32 0.01, %v4614_v61  ;;  %v2227_v58 = vadd.f32 %v4574_v32, %v2206_v33  ;;  %v3363_v27 = vpop.f32.mrb[106].mxu1 }
 0x6d5   :  { %v2306_v42 = vmul.f32 0.01, %v4617_v57  ;;  %v4648_v38 = vadd.f32 %v4568_v35, %v2077_v8  ;;  %v2334_v45 = vadd.f32 %v2318_v60, %v2270_v24  ;;  %v2335_v23 = vadd.f32 %v2319_v51, %v2271_v6  ;;  %v3395_v29 = vpop.f32.mrb[122].mxu0  ;;  %v2039_v56 = vpop.f32.mrb[107].mxu1 }
 0x6d6   :  { %vm2244_vm9 = vcmp.gt.f32.partialorder %v4601_v59, 0.0  ;;  %vm2292_vm10 = vcmp.gt.f32.partialorder %v4611_v18, 0.0  ;;  %vm2245_vm11 = vcmp.gt.f32.partialorder %v4614_v61, 0.0  ;;  %v2075_v50 = vadd.f32 %v2036_v52, %v4452_v40  ;;  %v2173_v41 = vpop.f32.mrb[123].mxu0 }
 0x6d7   :  { %v4655_v39 = vadd.f32 %v4574_v32, %v2211_v16  ;;  %v2078_v0 = vadd.f32 %v3363_v27, %v4464_v19  ;;  %v2209_v46 = vadd.f32 %v2170_v28, %v4454_v55  ;;  %vm2290_vm12 = vcmp.gt.f32.partialorder %v4617_v57, 0.0 }
 0x6d8   :  { %vm2243_vm13 = vcmp.gt.f32.partialorder %v4628_v20, 0.0  ;;  %v2259_v43 = vmul.f32 0.01, %v4628_v20  ;;  %v2309_v7 = vmul.f32 0.01, %v4631_v3  ;;  %vm2291_vm14 = vcmp.gt.f32.partialorder %v2227_v58, 0.0 }
 0x6d9   :  { %v2307_v22 = vmul.f32 0.01, %v2227_v58  ;;  %v2350_v40 = vpack.c.bf16 %v2335_v23, %v2334_v45  ;;  %v4664_v26 = vadd.f32 %v4568_v35, %v2075_v50  ;;  %v4667_v19 = vmul.f32 0.01, %v4648_v38 }
 0x6da   :  { %v3366_v24 = vpop.f32.mrb[108].mxu1  ;;  %v4670_v55 = vadd.f32 %v4568_v35, %v2078_v0  ;;  %v2076_v33 = vadd.f32 %v2039_v56, %v4456_v36  ;;  %v2212_v5 = vadd.f32 %v3395_v29, %v4466_v62  ;;  %v4675_v8 = vmul.f32 0.01, %v4655_v39 }
 0x6db   :  { %v2052_v6 = vpop.f32.mrb[109].mxu1  ;;  %v3398_v63 = vpop.f32.mrb[124].mxu0  ;;  %3416 = vmatprep.mubr.bf16.mxu1 %v2350_v40  ;;  %v4678_v60 = vadd.f32 %v4574_v32, %v2209_v46  ;;  %v2210_v51 = vadd.f32 %v2173_v41, %v4458_v37  ;;  %v2081_v52 = vadd.f32 %v3366_v24, %v4476_v49  ;;  %vm2293_vm15 = vcmp.gt.f32.partialorder %v4631_v3, 0.0 }
 0x6dc   :  { %v3367_v16 = vpop.f32.mrb[110].mxu1  ;;  %v2186_v28 = vpop.f32.mrb[125].mxu0  ;;  %vm2246_vm0 = vcmp.gt.f32.partialorder %v4664_v26, 0.0  ;;  %v2262_v36 = vmul.f32 0.01, %v4664_v26  ;;  %3417 = vmatmul.mubr.bf16.vlgmr.msra.gmra.mrb[112].mxu1 %v2351_v44  ;;  %v2097_v45 = vadd.f32 %v4568_v35, %v2076_v33  ;;  %v4693_v37 = vadd.f32 %v4574_v32, %v2212_v5 }
 0x6dd   :  { %v4689_v62 = vmul.f32 0.01, %v4670_v55  ;;  %v4696_v49 = vadd.f32 %v4574_v32, %v2210_v51  ;;  %v4699_v23 = vadd.f32 %v4568_v35, %v2081_v52  ;;  %v2055_v27 = vpop.f32.mrb[111].mxu1  ;;  %v3399_v29 = vpop.f32.mrb[126].mxu0  ;;  %3472 = vmatpush3.bf16.msra.mxu1 %v4525_v9  ;;  %v2274_v4 = vsel %vm2242_vm8, %v4604_v31, %v4623_v2 }
 0x6de   :  { %v2275_v21 = vsel %vm2243_vm13, %v4628_v20, %v2259_v43  ;;  %v2322_v44 = vsel %vm2290_vm12, %v4617_v57, %v2306_v42  ;;  %v2323_v50 = vsel %vm2291_vm14, %v2227_v58, %v2307_v22  ;;  %v2189_v0 = vpop.f32.mrb[127].mxu0  ;;  %3465 = vmatprep.subr.bf16.mxu1 %v4530_v10  ;;  %vm2248_vm1 = vcmp.gt.f32.partialorder %v4648_v38, 0.0 }
 0x6df   :  { %vm2249_vm2 = vcmp.gt.f32.partialorder %v4670_v55, 0.0  ;;  %vm2294_vm3 = vcmp.gt.f32.partialorder %v4678_v60, 0.0  ;;  %v2310_v9 = vmul.f32 0.01, %v4678_v60  ;;  %v2263_v31 = vmul.f32 0.01, %v2097_v45 }
 0x6e0   :  { %v4719_v2 = vmul.f32 0.01, %v4693_v37  ;;  %vm2247_vm4 = vcmp.gt.f32.partialorder %v2097_v45, 0.0  ;;  %vm2295_vm5 = vcmp.gt.f32.partialorder %v4696_v49, 0.0  ;;  %v2311_v57 = vmul.f32 0.01, %v4696_v49 }
 0x6e1   :  { %v4724_v20 = vmul.f32 0.01, %v4699_v23  ;;  %vm2296_vm6 = vcmp.gt.f32.partialorder %v4655_v39, 0.0  ;;  %vm2297_vm7 = vcmp.gt.f32.partialorder %v4693_v37, 0.0  ;;  %v2338_v42 = vadd.f32 %v2322_v44, %v2274_v4  ;;  %3473 = vmatpush3.bf16.msra.mxu1 %v4530_v10 }
 0x6e2   :  { %v2339_v58 = vadd.f32 %v2323_v50, %v2275_v21  ;;  %v2079_v46 = vadd.f32 %v2052_v6, %v4468_v30  ;;  %v2215_v56 = vadd.f32 %v3398_v63, %v4478_v15  ;;  %v2276_v41 = vsel %vm2244_vm9, %v4601_v59, %v4620_v1  ;;  %3466 = vmatprep.subr.bf16.mxu1 %v4539_v11 }
 0x6e3   :  { %v2277_v43 = vsel %vm2245_vm11, %v4614_v61, %v4643_v34  ;;  %v2324_v22 = vsel %vm2292_vm10, %v4611_v18, %v4640_v54  ;;  %v2325_v30 = vsel %vm2293_vm15, %v4631_v3, %v2309_v7  ;;  %vm2252_vm8 = vcmp.gt.f32.partialorder %v4699_v23, 0.0 }
 0x6e4   :  { %v2352_v15 = vpack.c.bf16 %v2339_v58, %v2338_v42  ;;  %v2100_v10 = vadd.f32 %v4568_v35, %v2079_v46  ;;  %v2236_v59 = vadd.f32 %v4574_v32, %v2215_v56  ;;  %v2340_v1 = vadd.f32 %v2324_v22, %v2276_v41 }
 0x6e5   :  { %v2341_v61 = vadd.f32 %v2325_v30, %v2277_v43  ;;  %v2082_v34 = vadd.f32 %v3367_v16, %v4480_v53  ;;  %v2213_v40 = vadd.f32 %v2186_v28, %v4470_v48  ;;  %v2080_v18 = vadd.f32 %v2055_v27, %v4472_v17  ;;  %3474 = vmatpush3.bf16.msra.mxu1 %v4539_v11 }
 0x6e6   :  { %3420 = vmatprep.mubr.bf16.mxu1 %v2352_v15  ;;  %vm2250_vm9 = vcmp.gt.f32.partialorder %v2100_v10, 0.0  ;;  %v2266_v3 = vmul.f32 0.01, %v2100_v10  ;;  %vm2300_vm10 = vcmp.gt.f32.partialorder %v2236_v59, 0.0  ;;  %v2316_v54 = vmul.f32 0.01, %v2236_v59  ;;  %3467 = vmatprep.subr.bf16.mxu1 %v4546_v12 }
 0x6e7   :  { %v2353_v7 = vpack.c.bf16 %v2341_v61, %v2340_v1  ;;  %v2103_v24 = vadd.f32 %v4568_v35, %v2082_v34  ;;  %v2234_v33 = vadd.f32 %v4574_v32, %v2213_v40  ;;  %v2101_v5 = vadd.f32 %v4568_v35, %v2080_v18 }
 0x6e8   :  { %v2216_v48 = vadd.f32 %v3399_v29, %v4482_v47  ;;  %v2214_v17 = vadd.f32 %v2189_v0, %v4474_v25  ;;  %v2278_v53 = vsel %vm2246_vm0, %v4664_v26, %v2262_v36  ;;  %v2279_v6 = vsel %vm2247_vm4, %v2097_v45, %v2263_v31  ;;  %v3623_v31 = vld [vmem:[%s5015_s8 + $0x30] sm:$0xff]  }
 0x6e9   :  { %3421 = vmatmul.mubr.bf16.gmra.mrb[116].mxu1 %v2353_v7  ;;  %vm2253_vm11 = vcmp.gt.f32.partialorder %v2103_v24, 0.0  ;;  %v2269_v11 = vmul.f32 0.01, %v2103_v24  ;;  %vm2298_vm12 = vcmp.gt.f32.partialorder %v2234_v33, 0.0  ;;  %v2314_v63 = vmul.f32 0.01, %v2234_v33  ;;  %3444 = vmatprep.subr.bf16.mxu0 %v3623_v31 }
 0x6ea   :  { %vm2251_vm13 = vcmp.gt.f32.partialorder %v2101_v5, 0.0  ;;  %v2267_v51 = vmul.f32 0.01, %v2101_v5  ;;  %v2237_v35 = vadd.f32 %v4574_v32, %v2216_v48  ;;  %v2235_v52 = vadd.f32 %v4574_v32, %v2214_v17  ;;  %3475 = vmatpush3.bf16.msra.mxu1 %v4546_v12  ;;  %3445 = vmatpush3.bf16.msra.mxu0 %v3623_v31 }
 0x6eb   :  { %v2326_v25 = vsel %vm2294_vm3, %v4678_v60, %v2310_v9  ;;  %v2327_v47 = vsel %vm2295_vm5, %v4696_v49, %v2311_v57  ;;  %v2280_v26 = vsel %vm2248_vm1, %v4648_v38, %v4667_v19  ;;  %v2281_v32 = vsel %vm2249_vm2, %v4670_v55, %v4689_v62  ;;  %3468 = vmatprep.subr.bf16.mxu1 %v4553_v13  ;;  %v3013_v57 = vld [vmem:[%s5014_s7 + $0x3] ss:$0 sm:$0xff] }
 0x6ec   :  { %vm2301_vm14 = vcmp.gt.f32.partialorder %v2237_v35, 0.0  ;;  %v2317_v12 = vmul.f32 0.01, %v2237_v35  ;;  %vm2299_vm15 = vcmp.gt.f32.partialorder %v2235_v52, 0.0  ;;  %v2315_v60 = vmul.f32 0.01, %v2235_v52 }
 0x6ed   :  { %v2342_v16 = vadd.f32 %v2326_v25, %v2278_v53  ;;  %v2343_v28 = vadd.f32 %v2327_v47, %v2279_v6  ;;  %v2328_v36 = vsel %vm2296_vm6, %v4655_v39, %v4675_v8  ;;  %v2329_v38 = vsel %vm2297_vm7, %v4693_v37, %v4719_v2  ;;  %v3624_v2 = vld [vmem:[%s5015_s8 + $0x38] sm:$0xff]  }
 0x6ee   :  { %v2344_v19 = vadd.f32 %v2328_v36, %v2280_v26  ;;  %v2345_v55 = vadd.f32 %v2329_v38, %v2281_v32  ;;  %v2282_v62 = vsel %vm2250_vm9, %v2100_v10, %v2266_v3  ;;  %v2283_v45 = vsel %vm2251_vm13, %v2101_v5, %v2267_v51  ;;  %3476 = vmatpush3.bf16.msra.mxu1 %v4553_v13 }
 0x6ef   :  { %v2354_v49 = vpack.c.bf16 %v2343_v28, %v2342_v16  ;;  %v2330_v27 = vsel %vm2298_vm12, %v2234_v33, %v2314_v63  ;;  %v2331_v29 = vsel %vm2299_vm15, %v2235_v52, %v2315_v60  ;;  %v2284_v39 = vsel %vm2252_vm8, %v4699_v23, %v4724_v20  ;;  %3469 = vmatprep.subr.bf16.mxu1 %v4560_v14  ;;  %v3022_v28 = vld [vmem:[%s5016_s9] ss:$0 sm:$0xff] }
 0x6f0   :  { %v2355_v8 = vpack.c.bf16 %v2345_v55, %v2344_v19  ;;  %v2346_v37 = vadd.f32 %v2330_v27, %v2282_v62  ;;  %v2347_v4 = vadd.f32 %v2331_v29, %v2283_v45  ;;  %v2285_v21 = vsel %vm2253_vm11, %v2103_v24, %v2269_v11  ;;  %3446 = vmatprep.subr.bf16.mxu0 %v3624_v2 }
 0x6f1   :  { %3424 = vmatprep.mubr.bf16.mxu1 %v2354_v49  ;;  %v2332_v44 = vsel %vm2300_vm10, %v2236_v59, %v2316_v54  ;;  %v2333_v13 = vsel %vm2301_vm14, %v2237_v35, %v2317_v12  ;;  %3447 = vmatpush3.bf16.msra.mxu0 %v3624_v2 }
 0x6f2   :  { %3425 = vmatmul.mubr.bf16.gmra.mrb[120].mxu1 %v2355_v8  ;;  %v2356_v50 = vpack.c.bf16 %v2347_v4, %v2346_v37  ;;  %v2348_v0 = vadd.f32 %v2332_v44, %v2284_v39  ;;  %v2349_v9 = vadd.f32 %v2333_v13, %v2285_v21 }
 0x6f3   :  { %3477 = vmatpush3.bf16.msra.mxu1 %v4560_v14 }
 0x6f4   :  { %3428 = vmatprep.mubr.bf16.mxu1 %v2356_v50  ;;  %v2357_v23 = vpack.c.bf16 %v2349_v9, %v2348_v0  ;;  %3470 = vmatprep.subr.bf16.mxu1 %v3623_v31 }
 0x6f7   :  { %3478 = vmatpush3.bf16.msra.mxu1 %v3623_v31 }
 0x6f8   :  { %3471 = vmatprep.subr.bf16.mxu1 %v3624_v2 }
 0x6fa   :  { %3429 = vmatmul.mubr.bf16.gmra.mrb[124].mxu1 %v2357_v23 }
 0x6fb   :  { %3479 = vmatpush3.bf16.msra.mxu1 %v3624_v2 }
 0x7af   :  { %v3418_v14 = vpop.f32.mrb[112].mxu1 }
 0x7b0   :  { %v2461_v20 = vpop.f32.mrb[113].mxu1  ;;  %v2470_v58 = vadd.f32 %v3418_v14, %v3013_v57 }
 0x7b1   :  { %v3419_v42 = vpop.f32.mrb[114].mxu1  ;;  %v2462_v41 = vadd.f32 %v3013_v57, %v2461_v20 }
 0x7b2   :  { %v2473_v46 = vadd.f32 %v3419_v42, %v3013_v57  ;;  %v2464_v56 = vpop.f32.mrb[115].mxu1 }
 0x7b3   :  { %v2465_v43 = vadd.f32 %v3013_v57, %v2464_v56 }
 0x7b4   :  { %v2525_v22 = vpack.c.bf16 %v2473_v46, %v2470_v58 }
 0x7b5   :  { %v2524_v30 = vpack.c.bf16 %v2465_v43, %v2462_v41 }
 0x7b7   :  { %3448 = vmatprep.mubr.bf16.mxu0 %v2524_v30 }
 0x7b8   :  { %3449 = vmatmul.mubr.bf16.vlgmr.msra.gmra.mrb[128].mxu0 %v2525_v22 }
 0x7bc   :  { %v3422_v15 = vpop.f32.mrb[116].mxu1 }
 0x7bd   :  { %v2477_v10 = vpop.f32.mrb[117].mxu1  ;;  %v2486_v1 = vadd.f32 %v3422_v15, %v3013_v57 }
 0x7be   :  { %v3423_v59 = vpop.f32.mrb[118].mxu1  ;;  %v2478_v40 = vadd.f32 %v3013_v57, %v2477_v10 }
 0x7bf   :  { %v2489_v61 = vadd.f32 %v3423_v59, %v3013_v57  ;;  %v2480_v34 = vpop.f32.mrb[119].mxu1 }
 0x7c0   :  { %v2481_v18 = vadd.f32 %v3013_v57, %v2480_v34 }
 0x7c1   :  { %v2527_v3 = vpack.c.bf16 %v2489_v61, %v2486_v1 }
 0x7c2   :  { %v2526_v54 = vpack.c.bf16 %v2481_v18, %v2478_v40 }
 0x7c4   :  { %3452 = vmatprep.mubr.bf16.mxu0 %v2526_v54 }
 0x7c5   :  { %v3426_v7 = vpop.f32.mrb[120].mxu1  ;;  %3453 = vmatmul.mubr.bf16.gmra.mrb[132].mxu0 %v2527_v3 }
 0x7c6   :  { %v2493_v24 = vpop.f32.mrb[121].mxu1  ;;  %v2502_v5 = vadd.f32 %v3426_v7, %v3013_v57 }
 0x7c7   :  { %v3427_v33 = vpop.f32.mrb[122].mxu1  ;;  %v2494_v53 = vadd.f32 %v3013_v57, %v2493_v24 }
 0x7c8   :  { %v2505_v48 = vadd.f32 %v3427_v33, %v3013_v57  ;;  %v2496_v17 = vpop.f32.mrb[123].mxu1 }
 0x7c9   :  { %v2497_v6 = vadd.f32 %v3013_v57, %v2496_v17 }
 0x7ca   :  { %v2529_v11 = vpack.c.bf16 %v2505_v48, %v2502_v5 }
 0x7cb   :  { %v2528_v63 = vpack.c.bf16 %v2497_v6, %v2494_v53 }
 0x7cd   :  { %v3430_v51 = vpop.f32.mrb[124].mxu1  ;;  %3456 = vmatprep.mubr.bf16.mxu1 %v2528_v63 }
 0x7ce   :  { %v2509_v35 = vpop.f32.mrb[125].mxu1  ;;  %3457 = vmatmul.mubr.bf16.vlgmr.msra.gmra.mrb[128].mxu1 %v2529_v11  ;;  %v2518_v25 = vadd.f32 %v3430_v51, %v3013_v57 }
 0x7cf   :  { %v3431_v52 = vpop.f32.mrb[126].mxu1  ;;  %v2510_v32 = vadd.f32 %v3013_v57, %v2509_v35 }
 0x7d0   :  { %v2521_v47 = vadd.f32 %v3431_v52, %v3013_v57  ;;  %v2512_v26 = vpop.f32.mrb[127].mxu1 }
 0x7d1   :  { %v2513_v12 = vadd.f32 %v3013_v57, %v2512_v26 }
 0x7d2   :  { %v2531_v60 = vpack.c.bf16 %v2521_v47, %v2518_v25 }
 0x7d3   :  { %v2530_v16 = vpack.c.bf16 %v2513_v12, %v2510_v32 }
 0x7d5   :  { %3460 = vmatprep.mubr.bf16.mxu1 %v2530_v16 }
 0x7d6   :  { %3461 = vmatmul.mubr.bf16.gmra.mrb[132].mxu1 %v2531_v60 }
 0x88b   :  { %v3450_v36 = vpop.f32.mrb[128].mxu0 }
 0x88c   :  { %v4815_v38 = vadd.f32 %v3450_v36, %v3022_v28  ;;  %v2637_v19 = vpop.f32.mrb[129].mxu0 }
 0x88d   :  { %v4817_v55 = vadd.f32 %v3022_v28, %v2637_v19  ;;  %v3451_v62 = vpop.f32.mrb[130].mxu0 }
 0x88e   :  { %2704 = vmax.xlane.f32.xlu1 %v4815_v38  ;;  %v2640_v45 = vpop.f32.mrb[131].mxu0  ;;  %v4821_v49 = vadd.f32 %v3451_v62, %v3022_v28 }
 0x88f   :  { %2700 = vmax.xlane.f32.xlu0 %v4817_v55  ;;  %v4823_v27 = vadd.f32 %v3022_v28, %v2640_v45 }
 0x892   :  { %2706 = vmax.xlane.f32.xlu1 %v4821_v49 }
 0x893   :  { %2702 = vmax.xlane.f32.xlu0 %v4823_v27 }
 0x898   :  { %v3454_v29 = vpop.f32.mrb[132].mxu0 }
 0x899   :  { %v4827_v39 = vadd.f32 %v3454_v29, %v3022_v28  ;;  %v2653_v8 = vpop.f32.mrb[133].mxu0 }
 0x89a   :  { %v3455_v37 = vpop.f32.mrb[134].mxu0  ;;  %v4832_v44 = vadd.f32 %v3022_v28, %v2653_v8 }
 0x89b   :  { %v4829_v4 = vadd.f32 %v3455_v37, %v3022_v28  ;;  %v2656_v21 = vpop.f32.mrb[135].mxu0  ;;  %2712 = vmax.xlane.f32.xlu0 %v4827_v39 }
 0x89c   :  { %v4835_v13 = vadd.f32 %v3022_v28, %v2656_v21 }
 0x89d   :  { %2714 = vmax.xlane.f32.xlu1 %v4829_v4 }
 0x89f   :  { %2708 = vmax.xlane.f32.xlu0 %v4832_v44 }
 0x8a1   :  { %v3458_v50 = vpop.f32.mrb[128].mxu1  ;;  %2710 = vmax.xlane.f32.xlu1 %v4835_v13 }
 0x8a2   :  { %v4839_v0 = vadd.f32 %v3458_v50, %v3022_v28  ;;  %v2669_v9 = vpop.f32.mrb[129].mxu1 }
 0x8a3   :  { %v3459_v23 = vpop.f32.mrb[130].mxu1  ;;  %v4844_v14 = vadd.f32 %v3022_v28, %v2669_v9 }
 0x8a4   :  { %v4841_v31 = vadd.f32 %v3459_v23, %v3022_v28  ;;  %v2672_v2 = vpop.f32.mrb[131].mxu1  ;;  %2720 = vmax.xlane.f32.xlu0 %v4839_v0 }
 0x8a5   :  { %v4847_v57 = vadd.f32 %v3022_v28, %v2672_v2 }
 0x8a6   :  { %2722 = vmax.xlane.f32.xlu1 %v4841_v31 }
 0x8a8   :  { %2716 = vmax.xlane.f32.xlu0 %v4844_v14 }
 0x8a9   :  { %v3462_v20 = vpop.f32.mrb[132].mxu1 }
 0x8aa   :  { %2718 = vmax.xlane.f32.xlu1 %v4847_v57  ;;  %v2685_v42 = vpop.f32.mrb[133].mxu1  ;;  %v4856_v43 = vadd.f32 %v3462_v20, %v3022_v28 }
 0x8ab   :  { %v4851_v58 = vadd.f32 %v3022_v28, %v2685_v42  ;;  %v3463_v46 = vpop.f32.mrb[134].mxu1 }
 0x8ac   :  { %v2688_v56 = vpop.f32.mrb[135].mxu1  ;;  %v4859_v22 = vadd.f32 %v3463_v46, %v3022_v28 }
 0x8ad   :  { %v4853_v41 = vadd.f32 %v3022_v28, %v2688_v56  ;;  %2724 = vmax.xlane.f32.xlu0 %v4851_v58 }
 0x8af   :  { %2726 = vmax.xlane.f32.xlu1 %v4853_v41 }
 0x8b1   :  { %2728 = vmax.xlane.f32.xlu0 %v4856_v43 }
 0x8b3   :  { %2730 = vmax.xlane.f32.xlu1 %v4859_v22 }
 0x91b   :  { %v4863_v30 = vpop.xlane.xlu1 %2704 }
 0x91c   :  { %v2734_v15 = vsub.f32 %v4815_v38, %v4863_v30  ;;  %v4867_v10 = vpop.xlane.xlu0 %2700 }
 0x91d   :  { %v2732_v59 = vsub.f32 %v4817_v55, %v4867_v10 }
 0x91e   :  { %v2752_v1 = vmul.f32 1.442695, %v2734_v15 }
 0x91f   :  { %v2748_v61 = vmul.f32 1.442695, %v2732_v59  ;;  %v4871_v34 = vpop.xlane.xlu1 %2706 }
 0x920   :  { %3625 = vpow2.f32 %v2752_v1  ;;  %v2735_v40 = vsub.f32 %v4821_v49, %v4871_v34  ;;  %v4875_v18 = vpop.xlane.xlu0 %2702 }
 0x921   :  { %v2733_v3 = vsub.f32 %v4823_v27, %v4875_v18  ;;  %3627 = vpow2.f32 %v2748_v61 }
 0x922   :  { %v2754_v54 = vmul.f32 1.442695, %v2735_v40 }
 0x923   :  { %v2750_v7 = vmul.f32 1.442695, %v2733_v3 }
 0x924   :  { %3629 = vpow2.f32 %v2754_v54 }
 0x925   :  { %3631 = vpow2.f32 %v2750_v7 }
 0x928   :  { %v4879_v24 = vpop.xlane.xlu0 %2712 }
 0x929   :  { %v2738_v33 = vsub.f32 %v4827_v39, %v4879_v24 }
 0x92a   :  { %v4883_v5 = vpop.xlane.xlu1 %2714  ;;  %v3626_v48 = vpop.eup %3625 }
 0x92b   :  { %v2760_v17 = vmul.f32 1.442695, %v2738_v33  ;;  %v2739_v53 = vsub.f32 %v4829_v4, %v4883_v5  ;;  %2784 = vadd.xlane.f32.xlu0 %v3626_v48  ;;  %v3628_v51 = vpop.eup %3627 }
 0x92c   :  { %v4887_v6 = vpop.xlane.xlu0 %2708 }
 0x92d   :  { %3633 = vpow2.f32 %v2760_v17  ;;  %v2762_v11 = vmul.f32 1.442695, %v2739_v53  ;;  %v2736_v63 = vsub.f32 %v4832_v44, %v4887_v6 }
 0x92e   :  { %v4891_v35 = vpop.xlane.xlu1 %2710  ;;  %v3630_v52 = vpop.eup %3629 }
 0x92f   :  { %3635 = vpow2.f32 %v2762_v11  ;;  %v2756_v25 = vmul.f32 1.442695, %v2736_v63  ;;  %v2737_v47 = vsub.f32 %v4835_v13, %v4891_v35  ;;  %2786 = vadd.xlane.f32.xlu1 %v3630_v52  ;;  %2780 = vadd.xlane.f32.xlu0 %v3628_v51  ;;  %v3632_v60 = vpop.eup %3631 }
 0x931   :  { %3637 = vpow2.f32 %v2756_v25  ;;  %v2758_v26 = vmul.f32 1.442695, %v2737_v47  ;;  %v4895_v32 = vpop.xlane.xlu0 %2720 }
 0x932   :  { %v2742_v12 = vsub.f32 %v4839_v0, %v4895_v32 }
 0x933   :  { %3639 = vpow2.f32 %v2758_v26  ;;  %v4899_v16 = vpop.xlane.xlu1 %2722  ;;  %2782 = vadd.xlane.f32.xlu1 %v3632_v60 }
 0x934   :  { %v2768_v28 = vmul.f32 1.442695, %v2742_v12  ;;  %v2743_v36 = vsub.f32 %v4841_v31, %v4899_v16 }
 0x935   :  { %v4903_v19 = vpop.xlane.xlu0 %2716 }
 0x936   :  { %3641 = vpow2.f32 %v2768_v28  ;;  %v2770_v62 = vmul.f32 1.442695, %v2743_v36  ;;  %v2740_v45 = vsub.f32 %v4844_v14, %v4903_v19 }
 0x937   :  { %v3634_v29 = vpop.eup %3633  ;;  %v4907_v8 = vpop.xlane.xlu1 %2718 }
 0x938   :  { %3643 = vpow2.f32 %v2770_v62  ;;  %v2764_v37 = vmul.f32 1.442695, %v2740_v45  ;;  %v2741_v21 = vsub.f32 %v4847_v57, %v4907_v8  ;;  %2792 = vadd.xlane.f32.xlu0 %v3634_v29 }
 0x939   :  { %v3636_v50 = vpop.eup %3635 }
 0x93a   :  { %3645 = vpow2.f32 %v2764_v37  ;;  %v2766_v9 = vmul.f32 1.442695, %v2741_v21  ;;  %v4911_v23 = vpop.xlane.xlu0 %2724  ;;  %2794 = vadd.xlane.f32.xlu1 %v3636_v50 }
 0x93b   :  { %v3638_v2 = vpop.eup %3637  ;;  %v2744_v20 = vsub.f32 %v4851_v58, %v4911_v23 }
 0x93c   :  { %3647 = vpow2.f32 %v2766_v9  ;;  %v4915_v42 = vpop.xlane.xlu1 %2726  ;;  %2788 = vadd.xlane.f32.xlu0 %v3638_v2 }
 0x93d   :  { %v3640_v46 = vpop.eup %3639  ;;  %v2772_v56 = vmul.f32 1.442695, %v2744_v20  ;;  %v2745_v15 = vsub.f32 %v4853_v41, %v4915_v42 }
 0x93e   :  { %v4919_v59 = vpop.xlane.xlu0 %2728  ;;  %2790 = vadd.xlane.f32.xlu1 %v3640_v46 }
 0x93f   :  { %3649 = vpow2.f32 %v2772_v56  ;;  %v2774_v1 = vmul.f32 1.442695, %v2745_v15  ;;  %v2746_v61 = vsub.f32 %v4856_v43, %v4919_v59 }
 0x940   :  { %v3642_v40 = vpop.eup %3641  ;;  %v4923_v3 = vpop.xlane.xlu1 %2730 }
 0x941   :  { %3651 = vpow2.f32 %v2774_v1  ;;  %v2776_v54 = vmul.f32 1.442695, %v2746_v61  ;;  %v2747_v7 = vsub.f32 %v4859_v22, %v4923_v3  ;;  %2800 = vadd.xlane.f32.xlu0 %v3642_v40 }
 0x942   :  { %v3644_v33 = vpop.eup %3643 }
 0x943   :  { %3653 = vpow2.f32 %v2776_v54  ;;  %v2778_v48 = vmul.f32 1.442695, %v2747_v7  ;;  %2802 = vadd.xlane.f32.xlu1 %v3644_v33 }
 0x944   :  { %v3646_v17 = vpop.eup %3645 }
 0x945   :  { %3655 = vpow2.f32 %v2778_v48  ;;  %2796 = vadd.xlane.f32.xlu0 %v3646_v17 }
 0x946   :  { %v3648_v53 = vpop.eup %3647 }
 0x947   :  { %2798 = vadd.xlane.f32.xlu1 %v3648_v53 }
 0x949   :  { %v3650_v11 = vpop.eup %3649 }
 0x94a   :  { %2804 = vadd.xlane.f32.xlu0 %v3650_v11 }
 0x94b   :  { %v3652_v63 = vpop.eup %3651 }
 0x94c   :  { %2806 = vadd.xlane.f32.xlu1 %v3652_v63 }
 0x94d   :  { %v3654_v51 = vpop.eup %3653 }
 0x94e   :  { %2808 = vadd.xlane.f32.xlu0 %v3654_v51 }
 0x94f   :  { %v3656_v52 = vpop.eup %3655 }
 0x950   :  { %2810 = vadd.xlane.f32.xlu1 %v3656_v52 }
 0x9b8   :  { %v2785_v25 = vpop.xlane.xlu0 %2784 }
 0x9b9   :  { %3657 = vlog2.f32 %v2785_v25 }
 0x9bc   :  { %v2787_v47 = vpop.xlane.xlu1 %2786  ;;  %v2781_v26 = vpop.xlane.xlu0 %2780 }
 0x9bd   :  { %3659 = vlog2.f32 %v2787_v47 }
 0x9be   :  { %3661 = vlog2.f32 %v2781_v26 }
 0x9c0   :  { %v2783_v12 = vpop.xlane.xlu1 %2782 }
 0x9c1   :  { %3663 = vlog2.f32 %v2783_v12 }
 0x9c3   :  { %v3658_v60 = vpop.eup %3657 }
 0x9c4   :  { %v2817_v28 = vmul.f32 0.6931472, %v3658_v60 }
 0x9c5   :  { %v2793_v36 = vpop.xlane.xlu0 %2792 }
 0x9c6   :  { %3665 = vlog2.f32 %v2793_v36  ;;  %v2846_v62 = vadd.f32 %v2817_v28, %v4863_v30 }
 0x9c7   :  { %v2795_v45 = vpop.xlane.xlu1 %2794  ;;  %v3660_v29 = vpop.eup %3659 }
 0x9c8   :  { %3667 = vlog2.f32 %v2795_v45  ;;  %v3662_v37 = vpop.eup %3661  ;;  %v2862_v21 = vsub.f32 %v4815_v38, %v2846_v62  ;;  %v2819_v50 = vmul.f32 0.6931472, %v3660_v29 }
 0x9c9   :  { %v2789_v9 = vpop.xlane.xlu0 %2788  ;;  %v2813_v2 = vmul.f32 0.6931472, %v3662_v37 }
 0x9ca   :  { %3669 = vlog2.f32 %v2789_v9  ;;  %2878 = vst [vmem:[%s5017_s10 + $0x10] sm:$0xff] %v2862_v21  ;;  %v2847_v20 = vadd.f32 %v2819_v50, %v4871_v34 }
 0x9cb   :  { %v2791_v46 = vpop.xlane.xlu1 %2790  ;;  %v3664_v56 = vpop.eup %3663  ;;  %v2844_v30 = vadd.f32 %v2813_v2, %v4867_v10 }
 0x9cc   :  { %3671 = vlog2.f32 %v2791_v46  ;;  %v2863_v15 = vsub.f32 %v4821_v49, %v2847_v20  ;;  %v2815_v1 = vmul.f32 0.6931472, %v3664_v56 }
 0x9cd   :  { %v2860_v38 = vsub.f32 %v4817_v55, %v2844_v30 }
 0x9ce   :  { %v2801_v61 = vpop.xlane.xlu0 %2800  ;;  %2879 = vst [vmem:[%s5017_s10 + $0x18] sm:$0xff] %v2863_v15  ;;  %v2845_v40 = vadd.f32 %v2815_v1, %v4875_v18 }
 0x9cf   :  { %3673 = vlog2.f32 %v2801_v61  ;;  %2876 = vst [vmem:[%s5017_s10] sm:$0xff] %v2860_v38 }
 0x9d0   :  { %v3666_v54 = vpop.eup %3665  ;;  %v2803_v10 = vpop.xlane.xlu1 %2802  ;;  %v2861_v34 = vsub.f32 %v4823_v27, %v2845_v40 }
 0x9d1   :  { %v2825_v49 = vmul.f32 0.6931472, %v3666_v54  ;;  %3675 = vlog2.f32 %v2803_v10 }
 0x9d2   :  { %v3668_v7 = vpop.eup %3667  ;;  %v2797_v55 = vpop.xlane.xlu0 %2796  ;;  %2877 = vst [vmem:[%s5017_s10 + $0x8] sm:$0xff] %v2861_v34 }
 0x9d3   :  { %v2850_v33 = vadd.f32 %v2825_v49, %v4879_v24  ;;  %v2827_v18 = vmul.f32 0.6931472, %v3668_v7  ;;  %3677 = vlog2.f32 %v2797_v55 }
 0x9d4   :  { %v3670_v48 = vpop.eup %3669  ;;  %v2799_v17 = vpop.xlane.xlu1 %2798 }
 0x9d5   :  { %v2866_v53 = vsub.f32 %v4827_v39, %v2850_v33  ;;  %v2851_v11 = vadd.f32 %v2827_v18, %v4883_v5  ;;  %v2821_v63 = vmul.f32 0.6931472, %v3670_v48  ;;  %3679 = vlog2.f32 %v2799_v17 }
 0x9d6   :  { %v3672_v27 = vpop.eup %3671 }
 0x9d7   :  { %2882 = vst [vmem:[%s5017_s10 + $0x30] sm:$0xff] %v2866_v53  ;;  %v2867_v51 = vsub.f32 %v4829_v4, %v2851_v11  ;;  %v2848_v52 = vadd.f32 %v2821_v63, %v4887_v6  ;;  %v2823_v24 = vmul.f32 0.6931472, %v3672_v27  ;;  %v2805_v25 = vpop.xlane.xlu0 %2804 }
 0x9d8   :  { %3681 = vlog2.f32 %v2805_v25 }
 0x9d9   :  { %v3674_v47 = vpop.eup %3673  ;;  %2883 = vst [vmem:[%s5017_s10 + $0x38] sm:$0xff] %v2867_v51  ;;  %v2864_v39 = vsub.f32 %v4832_v44, %v2848_v52  ;;  %v2849_v5 = vadd.f32 %v2823_v24, %v4891_v35  ;;  %v2807_v26 = vpop.xlane.xlu1 %2806 }
 0x9da   :  { %v2833_v12 = vmul.f32 0.6931472, %v3674_v47  ;;  %3683 = vlog2.f32 %v2807_v26 }
 0x9db   :  { %v3676_v60 = vpop.eup %3675  ;;  %2880 = vst [vmem:[%s5017_s10 + $0x20] sm:$0xff] %v2864_v39  ;;  %v2865_v4 = vsub.f32 %v4835_v13, %v2849_v5  ;;  %v2809_v6 = vpop.xlane.xlu0 %2808 }
 0x9dc   :  { %v2854_v28 = vadd.f32 %v2833_v12, %v4895_v32  ;;  %v2835_v36 = vmul.f32 0.6931472, %v3676_v60  ;;  %3685 = vlog2.f32 %v2809_v6 }
 0x9dd   :  { %v3678_v62 = vpop.eup %3677  ;;  %2881 = vst [vmem:[%s5017_s10 + $0x28] sm:$0xff] %v2865_v4  ;;  %v2811_v44 = vpop.xlane.xlu1 %2810 }
 0x9de   :  { %v2870_v35 = vsub.f32 %v4839_v0, %v2854_v28  ;;  %v2855_v45 = vadd.f32 %v2835_v36, %v4899_v16  ;;  %v2829_v29 = vmul.f32 0.6931472, %v3678_v62  ;;  %3687 = vlog2.f32 %v2811_v44 }
 0x9df   :  { %v3680_v37 = vpop.eup %3679 }
 0x9e0   :  { %2886 = vst [vmem:[%s5017_s10 + $0x50] sm:$0xff] %v2870_v35  ;;  %v2871_v13 = vsub.f32 %v4841_v31, %v2855_v45  ;;  %v2852_v32 = vadd.f32 %v2829_v29, %v4903_v19  ;;  %v2831_v21 = vmul.f32 0.6931472, %v3680_v37 }
 0x9e2   :  { %v3682_v50 = vpop.eup %3681  ;;  %2887 = vst [vmem:[%s5017_s10 + $0x58] sm:$0xff] %v2871_v13  ;;  %v2868_v0 = vsub.f32 %v4844_v14, %v2852_v32  ;;  %v2853_v16 = vadd.f32 %v2831_v21, %v4907_v8 }
 0x9e3   :  { %v2837_v9 = vmul.f32 0.6931472, %v3682_v50 }
 0x9e4   :  { %v3684_v2 = vpop.eup %3683  ;;  %2884 = vst [vmem:[%s5017_s10 + $0x40] sm:$0xff] %v2868_v0  ;;  %v2869_v31 = vsub.f32 %v4847_v57, %v2853_v16 }
 0x9e5   :  { %v2856_v19 = vadd.f32 %v2837_v9, %v4911_v23  ;;  %v2839_v20 = vmul.f32 0.6931472, %v3684_v2 }
 0x9e6   :  { %v3686_v46 = vpop.eup %3685  ;;  %2885 = vst [vmem:[%s5017_s10 + $0x48] sm:$0xff] %v2869_v31 }
 0x9e7   :  { %v2872_v14 = vsub.f32 %v4851_v58, %v2856_v19  ;;  %v2857_v8 = vadd.f32 %v2839_v20, %v4915_v42  ;;  %v2841_v56 = vmul.f32 0.6931472, %v3686_v46 }
 0x9e8   :  { %v3688_v30 = vpop.eup %3687 }
 0x9e9   :  { %2888 = vst [vmem:[%s5017_s10 + $0x60] sm:$0xff] %v2872_v14  ;;  %v2873_v57 = vsub.f32 %v4853_v41, %v2857_v8  ;;  %v2858_v23 = vadd.f32 %v2841_v56, %v4919_v59  ;;  %v2843_v15 = vmul.f32 0.6931472, %v3688_v30 }
 0x9eb   :  { %2889 = vst [vmem:[%s5017_s10 + $0x68] sm:$0xff] %v2873_v57  ;;  %v2874_v1 = vsub.f32 %v4856_v43, %v2858_v23  ;;  %v2859_v58 = vadd.f32 %v2843_v15, %v4923_v3 }
 0x9ed   :  { %2890 = vst [vmem:[%s5017_s10 + $0x70] sm:$0xff] %v2874_v1  ;;  %v2875_v42 = vsub.f32 %v4859_v22, %v2859_v58 }
 0x9ef   :  { %2891 = vst [vmem:[%s5017_s10 + $0x78] sm:$0xff] %v2875_v42 }
 0x9f0   :  { %2896 = vsyncmov [#allocation3] }
 0x9f3   :  { %s2897_s27 = vpop.sfrf %2896 }
 0x9f4   :  { %p3031_p0 = scmp.ne.s32.totalorder %s2897_s27, 0 }
 0x9f6   :  { %2901 = shalt.err (%p3031_p0)  }

</bundles_post_ra>
